<compile_context>
chip_gen: v7x
topology: tpu7x:2x2x1
jax: 0.10.0
libtpu: 0.0.40
codegen_flags: <defaults>
</compile_context>

<pallas_src>
import numpy as np
import jax
import jax.numpy as jnp
from jax import lax
from jax.experimental import pallas as pl
from jax.experimental.pallas import tpu as pltpu

# ---- FCConvE configuration (small shapes consistent with the module) ----
B = 256               # total queries scored per call
TB = 128              # batch tile (MXU-native row count)
NUM_ENT = 512         # ent_vocab_size
TILE_N = 512          # entity tile (lane-dense multiple of 128; whole vocab here)
NUM_REL = 16          # rel_vocab_size
EMB_DIM = 32          # embedding_dim
REL_DIM = 32          # rel_embedding_dim
IN_DIM = EMB_DIM + REL_DIM
FC1 = 64              # params.fc1
K_H, K_W = 4, 4       # params.k_h, params.k_w
KER_H, KER_W = 3, 3   # params.ker_sz
C_IN = FC1 // (K_H * K_W)        # k_in_channels = 4
C_OUT = 8                        # k_out_channels_1 (group_convolution != depthwise)
COUNT_H = 1                      # init_params sets count_h = 1
OH = COUNT_H * K_H - KER_H + 1   # flat_sz_h = 2
OW = K_W - KER_W + 1             # flat_sz_w = 2
FLAT = OH * OW * C_OUT           # flat_sz = 32
BN_EPS = 1e-5


# ------------------------------ Pallas kernel ------------------------------
def fcconve_kernel(x_ref, w1_ref, b1_ref, wc_ref, b2_ref, w2_ref, b3_ref,
                   we_ref, bias_ref, out_ref, feat_ref):
    # ---- feature pipeline: computed once per batch tile (entity tile j==0),
    # cached in VMEM scratch (bf16) and reused for every entity tile. ----
    @pl.when(pl.program_id(1) == 0)
    def _():
        # fc1 (+ folded bn1) + relu
        x = jnp.dot(x_ref[...], w1_ref[...],
                    preferred_element_type=jnp.float32) + b1_ref[...]
        x = jnp.maximum(x, 0.0)                                      # [TB, FC1]
        # conv1 (NCHW, valid, stride 1) lowered to matmul vs im2col'd weights,
        # bn2 folded into the weight matrix / bias row.
        x = jnp.dot(x, wc_ref[...],
                    preferred_element_type=jnp.float32) + b2_ref[...]
        x = jnp.maximum(x, 0.0)                                      # [TB, FLAT]
        # fc (+ folded bn3) + relu
        x = jnp.dot(x, w2_ref[...],
                    preferred_element_type=jnp.float32) + b3_ref[...]
        x = jnp.maximum(x, 0.0)                                      # [TB, EMB_DIM]
        feat_ref[...] = x.astype(feat_ref.dtype)                     # bf16 cache

    # ---- score against this entity tile: bf16 x bf16 MXU dot, f32 accumulate,
    # sigmoid via tanh (EUP slot, no inf intermediates). ----
    logits = jnp.dot(feat_ref[...], we_ref[...],
                     preferred_element_type=jnp.float32) + bias_ref[...]
    out_ref[...] = 0.5 * (jnp.tanh(0.5 * logits) + 1.0)              # [TB, TILE_N]
    # TODO(synk): emit bf16 probabilities / fuse the BCE loss here if the
    # downstream tolerates it (would halve the dominant HBM output stream).


def fcconve_forward(x_in, w1f, b1f, wcf, b2f, w2f, b3f, we_t, bias_row,
                    *, tb=TB, tile_n=TILE_N):
    b_tot, in_dim = x_in.shape
    emb_dim, n_ent = we_t.shape
    fc1 = w1f.shape[1]
    flat = wcf.shape[1]

    # Pad batch / entity axes so every grid tile is full (lane-dense padding);
    # padded entity columns score sigmoid(0)=0.5 and are sliced off below.
    b_pad = pl.cdiv(b_tot, tb) * tb
    n_pad = pl.cdiv(n_ent, tile_n) * tile_n
    if b_pad != b_tot:
        x_in = jnp.pad(x_in, ((0, b_pad - b_tot), (0, 0)))
    if n_pad != n_ent:
        we_t = jnp.pad(we_t, ((0, 0), (0, n_pad - n_ent)))
        bias_row = jnp.pad(bias_row, ((0, 0), (0, n_pad - n_ent)))

    grid = (b_pad // tb, n_pad // tile_n)

    flops = (2 * b_pad * (in_dim * fc1 + fc1 * flat + flat * emb_dim)   # features
             + 2 * b_pad * emb_dim * n_pad)                             # scoring
    bytes_accessed = (x_in.size * 4
                      + (w1f.size + wcf.size + w2f.size) * 4
                      + (b1f.size + b2f.size + b3f.size) * 4
                      + we_t.size * we_t.dtype.itemsize                 # bf16 stream
                      + bias_row.size * 4
                      + b_pad * n_pad * 4)                              # output

    out = pl.pallas_call(
        fcconve_kernel,
        out_shape=jax.ShapeDtypeStruct((b_pad, n_pad), jnp.float32),
        grid_spec=pltpu.PrefetchScalarGridSpec(
            num_scalar_prefetch=0,
            grid=grid,
            in_specs=[
                pl.BlockSpec((tb, in_dim), lambda i, j: (i, 0)),       # x_in
                pl.BlockSpec((in_dim, fc1), lambda i, j: (0, 0)),      # w1 (bn1 folded)
                pl.BlockSpec((1, fc1), lambda i, j: (0, 0)),           # b1 (bn1 folded)
                pl.BlockSpec((fc1, flat), lambda i, j: (0, 0)),        # conv-as-matmul (bn2 folded)
                pl.BlockSpec((1, flat), lambda i, j: (0, 0)),          # bn2 shift
                pl.BlockSpec((flat, emb_dim), lambda i, j: (0, 0)),    # fc (bn3 folded)
                pl.BlockSpec((1, emb_dim), lambda i, j: (0, 0)),       # fc bias (bn3 folded)
                pl.BlockSpec((emb_dim, tile_n), lambda i, j: (0, j)),  # E^T entity tile (bf16)
                pl.BlockSpec((1, tile_n), lambda i, j: (0, j)),        # ent bias tile
            ],
            out_specs=pl.BlockSpec((tb, tile_n), lambda i, j: (i, j)),
            scratch_shapes=[pltpu.VMEM((tb, emb_dim), jnp.bfloat16)],  # cached features
        ),
        compiler_params=pltpu.CompilerParams(
            # batch axis parallel (v7x megacore); entity axis must be
            # sequential ("arbitrary") so the feature scratch is valid.
            dimension_semantics=("parallel", "arbitrary")),
        cost_estimate=pl.CostEstimate(
            flops=flops,
            transcendentals=b_pad * n_pad,
            bytes_accessed=bytes_accessed),
    )(x_in, w1f, b1f, wcf, b2f, w2f, b3f, we_t, bias_row)

    return out[:b_tot, :n_ent]


# --------------------------- glue / parameter setup ---------------------------
def conv_weight_to_matmul(conv_w):
    """Lower a [C_OUT, C_IN, KER_H, KER_W] valid conv (stride 1) to a dense
    matrix so that  (x_flat @ mat)  ==  conv(x.view(B,C_IN,K_H,K_W)).view(B,FLAT)
    with PyTorch's (C, H, W) / (C_out, OH, OW) flattening order."""
    cw = np.asarray(conv_w, np.float32)
    mat = np.zeros((C_IN * K_H * K_W, C_OUT * OH * OW), np.float32)
    for o in range(C_OUT):
        for c in range(C_IN):
            for kh in range(KER_H):
                for kw in range(KER_W):
                    for oh in range(OH):
                        for ow in range(OW):
                            in_idx = c * (K_H * K_W) + (oh + kh) * K_W + (ow + kw)
                            out_idx = o * (OH * OW) + oh * OW + ow
                            mat[in_idx, out_idx] += cw[o, c, kh, kw]
    return jnp.asarray(mat)


def bn_fold(gamma, beta, mean, var):
    scale = gamma / jnp.sqrt(var + BN_EPS)
    shift = beta - mean * scale
    return scale, shift


def make_params(key):
    ks = jax.random.split(key, 16)
    p = {}
    p["ent_emb"] = jax.random.normal(ks[0], (NUM_ENT, EMB_DIM), jnp.float32) * 0.1
    p["rel_emb"] = jax.random.normal(ks[1], (NUM_REL, REL_DIM), jnp.float32) * 0.1
    # fc1: Linear(EMB+REL -> FC1)   weight [out, in]
    p["fc1_w"] = jax.random.normal(ks[2], (FC1, IN_DIM), jnp.float32) * 0.1
    p["fc1_b"] = jax.random.normal(ks[3], (FC1,), jnp.float32) * 0.05
    # conv1: Conv2d(C_IN -> C_OUT, 3x3, bias=False)
    p["conv_w"] = jax.random.normal(ks[4], (C_OUT, C_IN, KER_H, KER_W), jnp.float32) * 0.1
    # fc: Linear(FLAT -> EMB_DIM)
    p["fc_w"] = jax.random.normal(ks[5], (EMB_DIM, FLAT), jnp.float32) * 0.1
    p["fc_b"] = jax.random.normal(ks[6], (EMB_DIM,), jnp.float32) * 0.05
    # registered entity bias (module init: zeros)
    p["ent_bias"] = jnp.zeros((NUM_ENT,), jnp.float32)
    # BatchNorm running stats / affine params (inference mode)
    def bn(kg, kb, km, kv, n):
        return (1.0 + 0.1 * jax.random.normal(kg, (n,), jnp.float32),
                0.1 * jax.random.normal(kb, (n,), jnp.float32),
                0.1 * jax.random.normal(km, (n,), jnp.float32),
                1.0 + 0.1 * jax.random.uniform(kv, (n,), jnp.float32))
    p["bn1"] = bn(ks[7], ks[8], ks[9], ks[10], FC1)
    p["bn2"] = bn(ks[11], ks[12], ks[13], ks[14], C_OUT)
    kk = jax.random.split(ks[15], 4)
    p["bn3"] = bn(kk[0], kk[1], kk[2], kk[3], EMB_DIM)
    return p


def reference_forward(h_idx, r_idx, p):
    """Pure-JAX f32 reference matching the PyTorch forward (eval mode, bce score)."""
    h_e = jnp.take(p["ent_emb"], h_idx, axis=0)
    r_e = jnp.take(p["rel_emb"], r_idx, axis=0)
    x = jnp.concatenate([h_e, r_e], axis=1)
    x = x @ p["fc1_w"].T + p["fc1_b"]
    s1, o1 = bn_fold(*p["bn1"]); x = jnp.maximum(x * s1 + o1, 0.0)
    x4 = x.reshape(B, C_IN, K_H, K_W)
    y = lax.conv_general_dilated(x4, p["conv_w"], (1, 1), "VALID",
                                 dimension_numbers=("NCHW", "OIHW", "NCHW"))
    s2, o2 = bn_fold(*p["bn2"])
    y = jnp.maximum(y * s2[None, :, None, None] + o2[None, :, None, None], 0.0)
    x = y.reshape(B, FLAT)
    x = x @ p["fc_w"].T + p["fc_b"]
    s3, o3 = bn_fold(*p["bn3"]); x = jnp.maximum(x * s3 + o3, 0.0)
    logits = x @ p["ent_emb"].T + p["ent_bias"]
    return jax.nn.sigmoid(logits)


if __name__ == "__main__":
    key = jax.random.PRNGKey(0)
    kp, kh, kr = jax.random.split(key, 3)
    p = make_params(kp)

    # deterministic example inputs: entity / relation index vectors
    h_idx = jax.random.randint(kh, (B,), 0, NUM_ENT)
    r_idx = jax.random.randint(kr, (B,), 0, NUM_REL)

    # embedding lookups + lane-axis concat done wrapper-side (no in-kernel concat)
    h_emb = jnp.take(p["ent_emb"], h_idx, axis=0)          # [B, EMB_DIM]
    r_emb = jnp.take(p["rel_emb"], r_idx, axis=0)          # [B, REL_DIM]
    x_in = jnp.concatenate([h_emb, r_emb], axis=1)         # [B, IN_DIM]

    # fold BN into the preceding weights / biases (exact: ReLU follows BN)
    s1, o1 = bn_fold(*p["bn1"])
    s2, o2 = bn_fold(*p["bn2"])
    s3, o3 = bn_fold(*p["bn3"])

    w1f = p["fc1_w"].T * s1[None, :]                       # [IN_DIM, FC1]
    b1f = (p["fc1_b"] * s1 + o1).reshape(1, FC1)

    wc_mat = conv_weight_to_matmul(p["conv_w"])            # [FC1, FLAT]
    s2_flat = jnp.repeat(s2, OH * OW)                      # per-channel -> flat
    o2_flat = jnp.repeat(o2, OH * OW)
    wcf = wc_mat * s2_flat[None, :]
    b2f = o2_flat.reshape(1, FLAT)                         # conv has no bias

    w2f = p["fc_w"].T * s3[None, :]                        # [FLAT, EMB_DIM]
    b3f = (p["fc_b"] * s3 + o3).reshape(1, EMB_DIM)

    # streamed entity table kept in bf16 (halves the dominant HBM read stream)
    we_t = p["ent_emb"].T.astype(jnp.bfloat16)             # [EMB_DIM, NUM_ENT]
    bias_row = p["ent_bias"].reshape(1, NUM_ENT)

    out = fcconve_forward(x_in, w1f, b1f, wcf, b2f, w2f, b3f, we_t, bias_row)
    out = jax.block_until_ready(out)

    ref = jax.block_until_ready(reference_forward(h_idx, r_idx, p))
    assert out.shape == (B, NUM_ENT)
    # Tolerance deliberately loosened vs. the all-f32 version: the entity table
    # and cached feature activations are bf16 (~2e-3 relative error), the
    # scoring dot still accumulates in f32.
    np.testing.assert_allclose(np.asarray(out), np.asarray(ref), rtol=1e-2, atol=3e-3)

    # TODO(synk): dropout / training-mode BatchNorm are omitted (inference
    # semantics); Conv2d bias is assumed False; the 'one_to_x' negative-sampling
    # branch and the loss are not part of this kernel.
    print("KERNEL_OK")
</pallas_src>

<mosaic_0001>
module attributes {stable_mosaic.version = 11 : i64} {
  func.func @fcconve_kernel(%arg0: i32, %arg1: i32, %arg2: memref<128x64xf32, #tpu.memory_space<vmem>>, %arg3: memref<64x64xf32, #tpu.memory_space<vmem>>, %arg4: memref<1x64xf32, #tpu.memory_space<vmem>>, %arg5: memref<64x32xf32, #tpu.memory_space<vmem>>, %arg6: memref<1x32xf32, #tpu.memory_space<vmem>>, %arg7: memref<32x32xf32, #tpu.memory_space<vmem>>, %arg8: memref<1x32xf32, #tpu.memory_space<vmem>>, %arg9: memref<32x512xbf16, #tpu.memory_space<vmem>>, %arg10: memref<1x512xf32, #tpu.memory_space<vmem>>, %arg11: memref<128x512xf32, #tpu.memory_space<vmem>>, %arg12: memref<128x32xbf16, #tpu.memory_space<vmem>>) attributes {dimension_semantics = [#tpu.dimension_semantics<parallel>, #tpu.dimension_semantics<arbitrary>], iteration_bounds = array<i64: 2, 1>, scalar_prefetch = 0 : i64, scratch_operands = 1 : i64, tpu.core_type = #tpu.core_type<tc>, window_params = [{transform_indices = @transform_0, window_bounds = array<i64: 128, 64>}, {pipeline_mode = #tpu.pipeline_mode<synchronous>, transform_indices = @transform_1, window_bounds = array<i64: 64, 64>}, {pipeline_mode = #tpu.pipeline_mode<synchronous>, transform_indices = @transform_2, window_bounds = array<i64: 1, 64>}, {pipeline_mode = #tpu.pipeline_mode<synchronous>, transform_indices = @transform_3, window_bounds = array<i64: 64, 32>}, {pipeline_mode = #tpu.pipeline_mode<synchronous>, transform_indices = @transform_4, window_bounds = array<i64: 1, 32>}, {pipeline_mode = #tpu.pipeline_mode<synchronous>, transform_indices = @transform_5, window_bounds = array<i64: 32, 32>}, {pipeline_mode = #tpu.pipeline_mode<synchronous>, transform_indices = @transform_6, window_bounds = array<i64: 1, 32>}, {transform_indices = @transform_7, window_bounds = array<i64: 32, 512>}, {transform_indices = @transform_8, window_bounds = array<i64: 1, 512>}, {transform_indices = @transform_9, window_bounds = array<i64: 128, 512>}]} {
    %c0_i32 = arith.constant 0 : i32
    %0 = arith.cmpi eq, %arg1, %c0_i32 : i32
    %1 = arith.extui %0 : i1 to i32
    %c0_i32_0 = arith.constant 0 : i32
    %2 = arith.cmpi ne, %1, %c0_i32_0 : i32
    scf.if %2 {
      %c0_11 = arith.constant 0 : index
      %c0_12 = arith.constant 0 : index
      %17 = vector.load %arg2[%c0_11, %c0_12] : memref<128x64xf32, #tpu.memory_space<vmem>>, vector<128x64xf32>
      %c0_13 = arith.constant 0 : index
      %c0_14 = arith.constant 0 : index
      %18 = vector.load %arg3[%c0_13, %c0_14] : memref<64x64xf32, #tpu.memory_space<vmem>>, vector<64x64xf32>
      %cst_15 = arith.constant dense<0.000000e+00> : vector<128x64xf32>
      %19 = tpu.matmul %17, %18, %cst_15 {dimension_numbers = #tpu.dot_dimension_numbers<[1], [0], [0], [1], [0, 0, 1, 1], [], []>} : vector<128x64xf32>, vector<64x64xf32>, vector<128x64xf32> -> vector<128x64xf32>
      %c0_16 = arith.constant 0 : index
      %c0_17 = arith.constant 0 : index
      %20 = vector.load %arg4[%c0_16, %c0_17] : memref<1x64xf32, #tpu.memory_space<vmem>>, vector<1x64xf32>
      %21 = vector.broadcast %20 : vector<1x64xf32> to vector<128x64xf32>
      %22 = arith.addf %19, %21 : vector<128x64xf32>
      %cst_18 = arith.constant 0.000000e+00 : f32
      %23 = vector.broadcast %cst_18 : f32 to vector<128x64xf32>
      %24 = arith.maximumf %22, %23 : vector<128x64xf32>
      %c0_19 = arith.constant 0 : index
      %c0_20 = arith.constant 0 : index
      %25 = vector.load %arg5[%c0_19, %c0_20] : memref<64x32xf32, #tpu.memory_space<vmem>>, vector<64x32xf32>
      %cst_21 = arith.constant dense<0.000000e+00> : vector<128x32xf32>
      %26 = tpu.matmul %24, %25, %cst_21 {dimension_numbers = #tpu.dot_dimension_numbers<[1], [0], [0], [1], [0, 0, 1, 1], [], []>} : vector<128x64xf32>, vector<64x32xf32>, vector<128x32xf32> -> vector<128x32xf32>
      %c0_22 = arith.constant 0 : index
      %c0_23 = arith.constant 0 : index
      %27 = vector.load %arg6[%c0_22, %c0_23] : memref<1x32xf32, #tpu.memory_space<vmem>>, vector<1x32xf32>
      %28 = vector.broadcast %27 : vector<1x32xf32> to vector<128x32xf32>
      %29 = arith.addf %26, %28 : vector<128x32xf32>
      %cst_24 = arith.constant 0.000000e+00 : f32
      %30 = vector.broadcast %cst_24 : f32 to vector<128x32xf32>
      %31 = arith.maximumf %29, %30 : vector<128x32xf32>
      %c0_25 = arith.constant 0 : index
      %c0_26 = arith.constant 0 : index
      %32 = vector.load %arg7[%c0_25, %c0_26] : memref<32x32xf32, #tpu.memory_space<vmem>>, vector<32x32xf32>
      %cst_27 = arith.constant dense<0.000000e+00> : vector<128x32xf32>
      %33 = tpu.matmul %31, %32, %cst_27 {dimension_numbers = #tpu.dot_dimension_numbers<[1], [0], [0], [1], [0, 0, 1, 1], [], []>} : vector<128x32xf32>, vector<32x32xf32>, vector<128x32xf32> -> vector<128x32xf32>
      %c0_28 = arith.constant 0 : index
      %c0_29 = arith.constant 0 : index
      %34 = vector.load %arg8[%c0_28, %c0_29] : memref<1x32xf32, #tpu.memory_space<vmem>>, vector<1x32xf32>
      %35 = vector.broadcast %34 : vector<1x32xf32> to vector<128x32xf32>
      %36 = arith.addf %33, %35 : vector<128x32xf32>
      %cst_30 = arith.constant 0.000000e+00 : f32
      %37 = vector.broadcast %cst_30 : f32 to vector<128x32xf32>
      %38 = arith.maximumf %36, %37 : vector<128x32xf32>
      %39 = arith.truncf %38 : vector<128x32xf32> to vector<128x32xbf16>
      %c0_31 = arith.constant 0 : index
      %c0_32 = arith.constant 0 : index
      %40 = vector.load %arg12[%c0_31, %c0_32] : memref<128x32xbf16, #tpu.memory_space<vmem>>, vector<128x32xbf16>
      tpu.vector_store %arg12[%c0_31, %c0_32], %39 {strides = array<i32>} : memref<128x32xbf16, #tpu.memory_space<vmem>>, vector<128x32xbf16>,
    } else {
    }
    %c0 = arith.constant 0 : index
    %c0_1 = arith.constant 0 : index
    %3 = vector.load %arg12[%c0, %c0_1] : memref<128x32xbf16, #tpu.memory_space<vmem>>, vector<128x32xbf16>
    %c0_2 = arith.constant 0 : index
    %c0_3 = arith.constant 0 : index
    %4 = vector.load %arg9[%c0_2, %c0_3] : memref<32x512xbf16, #tpu.memory_space<vmem>>, vector<32x512xbf16>
    %cst = arith.constant dense<0.000000e+00> : vector<128x512xf32>
    %5 = tpu.matmul %3, %4, %cst {dimension_numbers = #tpu.dot_dimension_numbers<[1], [0], [0], [1], [0, 0, 1, 1], [], []>} : vector<128x32xbf16>, vector<32x512xbf16>, vector<128x512xf32> -> vector<128x512xf32>
    %c0_4 = arith.constant 0 : index
    %c0_5 = arith.constant 0 : index
    %6 = vector.load %arg10[%c0_4, %c0_5] : memref<1x512xf32, #tpu.memory_space<vmem>>, vector<1x512xf32>
    %7 = vector.broadcast %6 : vector<1x512xf32> to vector<128x512xf32>
    %8 = arith.addf %5, %7 : vector<128x512xf32>
    %cst_6 = arith.constant 5.000000e-01 : f32
    %9 = vector.broadcast %cst_6 : f32 to vector<128x512xf32>
    %10 = arith.mulf %9, %8 : vector<128x512xf32>
    %11 = math.tanh %10 : vector<128x512xf32>
    %cst_7 = arith.constant 1.000000e+00 : f32
    %12 = vector.broadcast %cst_7 : f32 to vector<128x512xf32>
    %13 = arith.addf %11, %12 : vector<128x512xf32>
    %cst_8 = arith.constant 5.000000e-01 : f32
    %14 = vector.broadcast %cst_8 : f32 to vector<128x512xf32>
    %15 = arith.mulf %14, %13 : vector<128x512xf32>
    %c0_9 = arith.constant 0 : index
    %c0_10 = arith.constant 0 : index
    %16 = vector.load %arg11[%c0_9, %c0_10] : memref<128x512xf32, #tpu.memory_space<vmem>>, vector<128x512xf32>
    tpu.vector_store %arg11[%c0_9, %c0_10], %15 {strides = array<i32>} : memref<128x512xf32, #tpu.memory_space<vmem>>, vector<128x512xf32>,
    return
  }
  func.func @transform_0(%arg0: i32, %arg1: i32) -> (i32, i32) {
    %c0_i32 = arith.constant 0 : i32
    %c0_i32_0 = arith.constant 0 : i32
    return %arg0, %c0_i32 : i32, i32
  }
  func.func @transform_1(%arg0: i32, %arg1: i32) -> (i32, i32) {
    %c0_i32 = arith.constant 0 : i32
    %c0_i32_0 = arith.constant 0 : i32
    %c0_i32_1 = arith.constant 0 : i32
    return %c0_i32, %c0_i32_0 : i32, i32
  }
  func.func @transform_2(%arg0: i32, %arg1: i32) -> (i32, i32) {
    %c0_i32 = arith.constant 0 : i32
    %c0_i32_0 = arith.constant 0 : i32
    %c0_i32_1 = arith.constant 0 : i32
    return %c0_i32, %c0_i32_0 : i32, i32
  }
  func.func @transform_3(%arg0: i32, %arg1: i32) -> (i32, i32) {
    %c0_i32 = arith.constant 0 : i32
    %c0_i32_0 = arith.constant 0 : i32
    %c0_i32_1 = arith.constant 0 : i32
    return %c0_i32, %c0_i32_0 : i32, i32
  }
  func.func @transform_4(%arg0: i32, %arg1: i32) -> (i32, i32) {
    %c0_i32 = arith.constant 0 : i32
    %c0_i32_0 = arith.constant 0 : i32
    %c0_i32_1 = arith.constant 0 : i32
    return %c0_i32, %c0_i32_0 : i32, i32
  }
  func.func @transform_5(%arg0: i32, %arg1: i32) -> (i32, i32) {
    %c0_i32 = arith.constant 0 : i32
    %c0_i32_0 = arith.constant 0 : i32
    %c0_i32_1 = arith.constant 0 : i32
    return %c0_i32, %c0_i32_0 : i32, i32
  }
  func.func @transform_6(%arg0: i32, %arg1: i32) -> (i32, i32) {
    %c0_i32 = arith.constant 0 : i32
    %c0_i32_0 = arith.constant 0 : i32
    %c0_i32_1 = arith.constant 0 : i32
    return %c0_i32, %c0_i32_0 : i32, i32
  }
  func.func @transform_7(%arg0: i32, %arg1: i32) -> (i32, i32) {
    %c0_i32 = arith.constant 0 : i32
    %c0_i32_0 = arith.constant 0 : i32
    return %c0_i32, %arg1 : i32, i32
  }
  func.func @transform_8(%arg0: i32, %arg1: i32) -> (i32, i32) {
    %c0_i32 = arith.constant 0 : i32
    %c0_i32_0 = arith.constant 0 : i32
    return %c0_i32, %arg1 : i32, i32
  }
  func.func @transform_9(%arg0: i32, %arg1: i32) -> (i32, i32) {
    %c0_i32 = arith.constant 0 : i32
    return %arg0, %arg1 : i32, i32
  }
}

</mosaic_0001>

<bundles_post_ra>
// kernel: tpu_custom_call.1
= control target key start
LH: loop header
LB: loop body
LE: loop exit
PB: predicated region body
PF: predicated region fallthrough
CT: control target
= control target key end

     0   :  { %14 = vsyncpa [#allocation4], 0  ;;  %s3086_s0 = inlined_call_operand.vmem [shape: f32[256,64], index: 0, kind: input, shape index: {}]   ;;  %s3087_s1 = inlined_call_operand.vmem [shape: f32[64,64], index: 1, kind: input, shape index: {}]   ;;  %s3088_s2 = inlined_call_operand.vmem [shape: f32[1,64], index: 2, kind: input, shape index: {}]   ;;  %s3089_s3 = inlined_call_operand.vmem [shape: f32[64,32], index: 3, kind: input, shape index: {}]   ;;  %s3090_s4 = inlined_call_operand.vmem [shape: f32[1,32], index: 4, kind: input, shape index: {}]   ;;  %s3091_s5 = inlined_call_operand.vmem [shape: f32[32,32], index: 5, kind: input, shape index: {}]   ;;  %s3092_s6 = inlined_call_operand.vmem [shape: f32[1,32], index: 6, kind: input, shape index: {}]   ;;  %s3093_s7 = inlined_call_operand.vmem [shape: bf16[32,512], index: 7, kind: input, shape index: {}]   ;;  %s3094_s8 = inlined_call_operand.vmem [shape: f32[1,512], index: 8, kind: input, shape index: {}]   ;;  %s3095_s9 = inlined_call_operand.hbm [shape: f32[256,512], index: 9, kind: output, shape index: {}]  }
   0x1   :  { %16 = vsyncpa [#allocation4 + $0x1], 0  ;;  %s2516_s30 = smov 0   ;;  %s2518_s10 = smov 0  }
   0x2   :  { %s2520_s11 = smov 0   ;;  %s2522_s12 = smov 0  }
   0x3   :  { %s2524_s13 = smov 0   ;;  %s2526_s14 = smov 0  }
   0x4 LB: > { %s1863_s15 = sadd.s32 4294967295, %s2460_s14   ;;  %s1864_s16 = sadd.s32 4294967294, %s2460_s14   ;;  %s2460_s14 = sphi %s2526_s14, %s22_s14   ;;  %s2456_s13 = sphi %s2524_s13, %s3102_s13   ;;  %s2452_s12 = sphi %s2522_s12, %s3101_s12   ;;  %s2448_s11 = sphi %s2520_s11, %s3100_s11   ;;  %s2444_s10 = sphi %s2518_s10, %s3099_s10   ;;  %s2440_s30 = sphi %s2516_s30, %s3098_s30  }
   0x5   : > { %s34_s17 = sadd.s32 1, %s2456_s13  ;;  %s247_s18 = sadd.s32 1, %s2448_s11 }
   0x6   : > { %p36_p0 = scmp.ge.s32.totalorder %s34_s17, 2  ;;  %p257_p1 = scmp.ne.s32.totalorder %s2448_s11, %s2444_s10 }
   0x7   : > { %p258_p2 = scmp.eq.s32.totalorder %s1863_s15, 1  ;;  %p263_p3 = scmp.ne.s32.totalorder %s2444_s10, %s2440_s30 }
   0x8   : > { %s3104_s17 = smov (%p36_p0, %s34_s17), 0  ;;  %p264_p5 = scmp.eq.s32.totalorder %s1864_s16, 1 }
   0x9   : > { %p2556_p4 = por %p258_p2, %p257_p1  ;;  %s242_s20 = ssub.s32 %s2456_s13, %s3104_s17 }
   0xa   : > { %p1869_p6 = scmp.ge.s32.totalorder %s2460_s14, 1  ;;  %p245_p7 = scmp.eq.s32.totalorder %s242_s20, 0 }
   0xb   : > { %p2563_p8 = por %p264_p5, %p263_p3  ;;  %p326_p9 = scmp.lt.s32.totalorder %s2460_s14, 3 }
   0xc   : > { %s2569_s22 = scalar_select %p245_p7, %s2448_s11, %s247_s18  }
   0xd   : > { %p327_p10 = pnand %p1869_p6, %p326_p9 }
   0xe   : > { %v411_v0 = vld [vmem:[%s3087_s1] sm:$0xff] (!%p327_p10)  ;;  %v412_v1 = vld [vmem:[%s3087_s1 + $0x8] sm:$0xff] (!%p327_p10)  ;;  %v413_v2 = vld [vmem:[%s3087_s1 + $0x10] sm:$0xff] (!%p327_p10)  ;;  %s1871_s29 = sshll.u32 (!%p327_p10), %s2452_s12, 4  ;;  %vm426_vm0 = vcmask (!%p327_p10), 523264   ;;  %vm871_vm1 = vcmask (!%p327_p10), 261120  }
   0xf   : > { %330 = sbr.rel (%p327_p10) target bundleno = 1018 (0x3fa), region = 56  ;;  %v2136_v3 = vpack.c.bf16 (!%p327_p10), %v412_v1, %v411_v0  ;;  %v414_v4 = vld [vmem:[%s3087_s1 + $0x18] sm:$0xff] (!%p327_p10)  ;;  %p372_p11 = scmp.lt.s32.totalorder (!%p327_p10), %s1871_s29, 31  ;;  %v415_v6 = vld [vmem:[%s3087_s1 + $0x20] sm:$0xff] (!%p327_p10)  ;;  %v416_v7 = vld [vmem:[%s3087_s1 + $0x28] sm:$0xff] (!%p327_p10) }
  0x10   : > { %v2140_v5 = vpack.c.bf16 (!%p327_p10), %v414_v4, %v413_v2  ;;  %v417_v8 = vld [vmem:[%s3087_s1 + $0x30] sm:$0xff] (!%p327_p10)  ;;  %v418_v9 = vld [vmem:[%s3087_s1 + $0x38] sm:$0xff] (!%p327_p10)  ;;  %v2144_v10 = vpack.c.bf16 (!%p327_p10), %v416_v7, %v415_v6  ;;  %v636_v14 = vld [vmem:[%s3089_s3] sm:$0xff] (!%p327_p10)  ;;  %s368_s27 = sand.u32 (!%p327_p10), 1, %s2444_s10   ;;  %s2463_s25 = smov (!%p327_p10), [#allocation3]  }
  0x11   : > { %2137 = vmatprep.subr.bf16.mxu0 (!%p327_p10), %v2136_v3  ;;  %2176 = vmatprep.subr.bf16.mxu1 (!%p327_p10), %v2136_v3  ;;  %v2148_v12 = vpack.c.bf16 (!%p327_p10), %v418_v9, %v417_v8  ;;  %v637_v15 = vld [vmem:[%s3089_s3 + $0x8] sm:$0xff] (!%p327_p10)  ;;  %v638_v17 = vld [vmem:[%s3089_s3 + $0x10] sm:$0xff] (!%p327_p10)  ;;  %v639_v18 = vld [vmem:[%s3089_s3 + $0x18] sm:$0xff] (!%p327_p10)  ;;  %s2840_s28 = sshll.u32 (!%p327_p10), %s368_s27, 9  ;;  %s2386_s26 = sshll.u32 (!%p327_p10), %s2463_s25, 4  ;;  %s2387_s26 = int_to_ptr.vmem [resolvable:$false] %s2386_s26 }
  0x12   : > { %2139 = vmatpush3.bf16.msra.mxu0 (!%p327_p10), %v2136_v3  ;;  %2180 = vmatpush3.bf16.msra.mxu1 (!%p327_p10), %v2136_v3  ;;  %v2152_v16 = vpack.c.bf16 (!%p327_p10), %v637_v15, %v636_v14  ;;  %v2156_v23 = vpack.c.bf16 (!%p327_p10), %v639_v18, %v638_v17  ;;  %v640_v24 = vld [vmem:[%s3089_s3 + $0x20] sm:$0xff] (!%p327_p10)  ;;  %v641_v25 = vld [vmem:[%s3089_s3 + $0x28] sm:$0xff] (!%p327_p10)  ;;  %v642_v37 = vld [vmem:[%s3089_s3 + $0x30] sm:$0xff] (!%p327_p10) }
  0x13   : > { %2141 = vmatprep.subr.bf16.mxu0 (!%p327_p10), %v2140_v5  ;;  %2177 = vmatprep.subr.bf16.mxu1 (!%p327_p10), %v2140_v5  ;;  %v2160_v30 = vpack.c.bf16 (!%p327_p10), %v641_v25, %v640_v24  ;;  %v643_v38 = vld [vmem:[%s3089_s3 + $0x38] sm:$0xff] (!%p327_p10)  ;;  %v860_v40 = vld [vmem:[%s3091_s5] sm:$0xff] (!%p327_p10)  ;;  %v861_v41 = vld [vmem:[%s3091_s5 + $0x8] sm:$0xff] (!%p327_p10) }
  0x14   : > { %v2164_v39 = vpack.c.bf16 (!%p327_p10), %v643_v38, %v642_v37  ;;  %v862_v42 = vld [vmem:[%s3091_s5 + $0x10] sm:$0xff] (!%p327_p10)  ;;  %v2168_v43 = vpack.c.bf16 (!%p327_p10), %v861_v41, %v860_v40  ;;  %v863_v44 = vld [vmem:[%s3091_s5 + $0x18] sm:$0xff] (!%p327_p10)  ;;  %v1873_v46 = vld [vmem:[%s3088_s2] ss:$0 sm:$0xff] (!%p327_p10) }
  0x15   : > { %v2172_v45 = vpack.c.bf16 (!%p327_p10), %v863_v44, %v862_v42 }
  0x16   : > { %s3106_s29 = smov (!%p372_p11, %s1871_s29), 31  ;;  %2143 = vmatpush3.bf16.msra.mxu0 %v2140_v5  ;;  %2181 = vmatpush3.bf16.msra.mxu1 %v2140_v5 }
  0x17   : > { %s1872_s15 = sshll.u32 %s3106_s29, 3  ;;  %2145 = vmatprep.subr.bf16.mxu0 %v2144_v10  ;;  %2178 = vmatprep.subr.bf16.mxu1 %v2144_v10 }
  0x18   : > { %s2599_s20 = scalar_lea.vmem %s3086_s0, %s1872_s15  ;;  %s2848_s15 = scalar_lea.vmem [#allocation3], %s2840_s28 }
  0x19   : > { %v395_v11 = vld [vmem:[%s2599_s20] sm:$0xff]  ;;  %v396_v19 = vld [vmem:[%s2599_s20 + $0x8] sm:$0xff]  ;;  %v397_v20 = vld [vmem:[%s2599_s20 + $0x10] sm:$0xff]  ;;  %s1763_s16 = sshll.u32 %s2848_s15, 4  ;;  %s2388_s28 = scalar_lea.vmem %s2387_s26, 16384  ;;  %s3034_s16 = int_to_ptr.vmem [resolvable:$true] %s1763_s16 }
  0x1a   : > { %2040 = vmatprep.mubr.msk.f32.mxu0 %vm426_vm0, %v395_v11  ;;  %v403_v13 = vld [vmem:[%s2599_s20 + $0x40] sm:$0xff]  ;;  %2147 = vmatpush3.bf16.msra.mxu0 %v2144_v10  ;;  %v404_v21 = vld [vmem:[%s2599_s20 + $0x48] sm:$0xff]  ;;  %v405_v22 = vld [vmem:[%s2599_s20 + $0x50] sm:$0xff]  ;;  %s2382_s24 = scalar_lea.vmem %s3034_s16, 8192  ;;  %p2389_p1 = scmp.lt.s32.totalorder %s3034_s16, %s2387_s26 }
  0x1b   : > { %2052 = vmatprep.mubr.msk.f32.mxu1 %vm426_vm0, %v403_v13  ;;  %2149 = vmatprep.subr.bf16.mxu0 %v2148_v12  ;;  %v398_v26 = vld [vmem:[%s2599_s20 + $0x18] sm:$0xff]  ;;  %v399_v27 = vld [vmem:[%s2599_s20 + $0x20] sm:$0xff]  ;;  %v400_v31 = vld [vmem:[%s2599_s20 + $0x28] sm:$0xff]  ;;  %p2383_p12 = scmp.ne.s32.totalorder %s3034_s16, %s2382_s24  ;;  %p2390_p2 = scmp.lt.s32.totalorder %s2388_s28, %s2382_s24 }
  0x1c   : > { %2182 = vmatpush3.bf16.msra.mxu1 %v2144_v10  ;;  %v406_v28 = vld [vmem:[%s2599_s20 + $0x58] sm:$0xff]  ;;  %v407_v29 = vld [vmem:[%s2599_s20 + $0x60] sm:$0xff]  ;;  %v401_v32 = vld [vmem:[%s2599_s20 + $0x30] sm:$0xff] }
  0x1d   : > { %2179 = vmatprep.subr.bf16.mxu1 %v2148_v12  ;;  %v408_v33 = vld [vmem:[%s2599_s20 + $0x68] sm:$0xff]  ;;  %v409_v34 = vld [vmem:[%s2599_s20 + $0x70] sm:$0xff]  ;;  %v402_v35 = vld [vmem:[%s2599_s20 + $0x38] sm:$0xff]  ;;  %p2384_p13 = pnand %p2383_p12, %p2556_p4  ;;  %p2391_p3 = por %p2390_p2, %p2389_p1 }
  0x1e   : > { %2151 = vmatpush3.bf16.msra.mxu0 %v2148_v12  ;;  %v410_v36 = vld [vmem:[%s2599_s20 + $0x78] sm:$0xff]  ;;  %s1955_s20 = sshll.u32 %s2452_s12, 13  ;;  %s3040_s12 = scalar_lea.sflag [#allocation4], %s368_s27 }
  0x1f   : > { %2169 = vmatprep.subr.bf16.mxu0 %v2168_v43  ;;  %s3032_s23 = scalar_lea.hbm %s3095_s9, %s1955_s20  ;;  %p2385_p0 = pneg %p2384_p13 }
  0x20   : > { %2183 = vmatpush3.bf16.msra.mxu1 %v2148_v12 }
  0x21   : > { %2153 = vmatprep.subr.bf16.mxu1 %v2152_v16  ;;  %2041 = vmatmul.mubr.msk.f32.vlgmr.msra.gmra.mrb[0].mxu0 %vm426_vm0, %v396_v19  ;;  %p2392_p5 = pnand %p2391_p3, %p2385_p0 }
  0x22   : > { %2043 = vmatprep.mubr.msk.f32.mxu0 %vm426_vm0, %v397_v20  ;;  %2171 = vmatpush3.bf16.msra.mxu0 %v2168_v43  ;;  %v2245_v43 = vld [vmem:[%s3093_s7 + $0x8] ss:$16 sps:$4 sm:$0xff]  }
  0x23   : > { %2053 = vmatmul.mubr.msk.f32.vlgmr.msra.gmra.mrb[0].mxu1 %vm426_vm0, %v404_v21  ;;  %2173 = vmatprep.subr.bf16.mxu0 %v2172_v45 }
  0x24   : > { %2055 = vmatprep.mubr.msk.f32.mxu1 %vm426_vm0, %v405_v22  ;;  %2155 = vmatpush3.bf16.msra.mxu1 %v2152_v16 }
  0x25   : > { %2157 = vmatprep.subr.bf16.mxu1 %v2156_v23  ;;  %2044 = vmatmul.mubr.msk.f32.gmra.mrb[2].mxu0 %vm426_vm0, %v398_v26 }
  0x26   : > { %2046 = vmatprep.mubr.msk.f32.mxu0 %vm426_vm0, %v399_v27  ;;  %2175 = vmatpush3.bf16.msra.mxu0 %v2172_v45 }
  0x27   : > { %2056 = vmatmul.mubr.msk.f32.gmra.mrb[2].mxu1 %vm426_vm0, %v406_v28 }
  0x28   : > { %2058 = vmatprep.mubr.msk.f32.mxu1 %vm426_vm0, %v407_v29  ;;  %2159 = vmatpush3.bf16.msra.mxu1 %v2156_v23 }
  0x29   : > { %2161 = vmatprep.subr.bf16.mxu1 %v2160_v30  ;;  %2047 = vmatmul.mubr.msk.f32.gmra.mrb[4].mxu0 %vm426_vm0, %v400_v31  ;;  %v2242_v31 = vld [vmem:[%s3093_s7] ss:$16 sps:$4 sm:$0xff]  }
  0x2a   : > { %2049 = vmatprep.mubr.msk.f32.mxu0 %vm426_vm0, %v401_v32  ;;  %v2244_v32 = vld [vmem:[%s3093_s7 + $0x4] ss:$16 sps:$4 sm:$0xff]  }
  0x2b   : > { %2059 = vmatmul.mubr.msk.f32.gmra.mrb[4].mxu1 %vm426_vm0, %v408_v33  ;;  %v2247_v33 = vld [vmem:[%s3093_s7 + $0xc] ss:$16 sps:$4 sm:$0xff]  }
  0x2c   : > { %2061 = vmatprep.mubr.msk.f32.mxu1 %vm426_vm0, %v409_v34  ;;  %2163 = vmatpush3.bf16.msra.mxu1 %v2160_v30  ;;  %v2250_v34 = vld [vmem:[%s3093_s7 + $0x24] ss:$16 sps:$4 sm:$0xff]  }
  0x2d   : > { %2050 = vmatmul.mubr.msk.f32.gmra.mrb[6].mxu0 %vm426_vm0, %v402_v35  ;;  %2165 = vmatprep.subr.bf16.mxu1 %v2164_v39  ;;  %v2248_v35 = vld [vmem:[%s3093_s7 + $0x20] ss:$16 sps:$4 sm:$0xff]  }
  0x2e   : > { %1313 = vmatprep.subr.bf16.mxu0 %v2247_v33 }
  0x2f   : > { %2062 = vmatmul.mubr.msk.f32.gmra.mrb[6].mxu1 %vm426_vm0, %v410_v36  ;;  %v2706_v36 = vld [vmem:[%s3090_s4] ss:$0 sm:$0xff] }
  0x30   : > { %2167 = vmatpush3.bf16.msra.mxu1 %v2164_v39 }
  0x31   : > { %1200 = vmatprep.subr.bf16.mxu1 %v2244_v32 }
  0xf4   : > { %v2042_v47 = vpop.f32.mrb[0].mxu0 }
  0xf5   : > { %v547_v48 = vadd.f32 %v2042_v47, %v1873_v46  ;;  %v541_v49 = vpop.f32.mrb[1].mxu0  ;;  %v2253_v47 = vld [vmem:[%s3093_s7 + $0x2c] ss:$16 sps:$4 sm:$0xff]  }
  0xf6   : > { %v2054_v50 = vpop.f32.mrb[0].mxu1  ;;  %v542_v51 = vadd.f32 %v1873_v46, %v541_v49 }
  0xf7   : > { %v581_v52 = vpop.f32.mrb[1].mxu1  ;;  %v621_v55 = vmax.f32 %v547_v48, 0.0  ;;  %v587_v15 = vadd.f32 %v2054_v50, %v1873_v46 }
  0xf8   : > { %v620_v53 = vmax.f32 %v542_v51, 0.0  ;;  %v2045_v54 = vpop.f32.mrb[2].mxu0  ;;  %v582_v8 = vadd.f32 %v1873_v46, %v581_v52  ;;  %v2251_v52 = vld [vmem:[%s3093_s7 + $0x28] ss:$16 sps:$4 sm:$0xff]  }
  0xf9   : > { %v557_v56 = vadd.f32 %v2045_v54, %v1873_v46  ;;  %v551_v57 = vpop.f32.mrb[3].mxu0  ;;  %v629_v19 = vmax.f32 %v587_v15, 0.0 }
  0xfa   : > { %v2057_v58 = vpop.f32.mrb[2].mxu1  ;;  %v552_v59 = vadd.f32 %v1873_v46, %v551_v57  ;;  %2080 = vmatprep.mubr.msk.f32.mxu1 %vm426_vm0, %v620_v53  ;;  %v628_v17 = vmax.f32 %v582_v8, 0.0 }
  0xfb   : > { %v591_v60 = vpop.f32.mrb[3].mxu1  ;;  %v623_v61 = vmax.f32 %v557_v56, 0.0  ;;  %2081 = vmatmul.mubr.msk.f32.vlgmr.msra.gmra.mrb[8].mxu1 %vm426_vm0, %v621_v55  ;;  %v597_v20 = vadd.f32 %v2057_v58, %v1873_v46 }
  0xfc   : > { %v622_v62 = vmax.f32 %v552_v59, 0.0  ;;  %v2048_v63 = vpop.f32.mrb[4].mxu0  ;;  %v592_v18 = vadd.f32 %v1873_v46, %v591_v60  ;;  %1201 = vmatpush1.bf16.msra.mxu1 %v2242_v31 }
  0xfd   : > { %v567_v0 = vadd.f32 %v2048_v63, %v1873_v46  ;;  %v561_v1 = vpop.f32.mrb[5].mxu0  ;;  %v631_v23 = vmax.f32 %v597_v20, 0.0  ;;  %1202 = vmatprep.subr.bf16.mxu1 %v2250_v34 }
  0xfe   : > { %v2060_v2 = vpop.f32.mrb[4].mxu1  ;;  %2083 = vmatprep.mubr.msk.f32.mxu1 %vm426_vm0, %v622_v62  ;;  %v562_v3 = vadd.f32 %v1873_v46, %v561_v1  ;;  %v630_v21 = vmax.f32 %v592_v18, 0.0 }
  0xff   : > { %v601_v4 = vpop.f32.mrb[5].mxu1  ;;  %v625_v5 = vmax.f32 %v567_v0, 0.0  ;;  %2084 = vmatmul.mubr.msk.f32.gmra.mrb[10].mxu1 %vm426_vm0, %v623_v61  ;;  %v607_v24 = vadd.f32 %v2060_v2, %v1873_v46 }
 0x100   : > { %v624_v6 = vmax.f32 %v562_v3, 0.0  ;;  %v2051_v7 = vpop.f32.mrb[6].mxu0  ;;  %v602_v22 = vadd.f32 %v1873_v46, %v601_v4  ;;  %1203 = vmatpush1.bf16.msra.mxu1 %v2248_v35 }
 0x101   : > { %v577_v9 = vadd.f32 %v2051_v7, %v1873_v46  ;;  %v571_v10 = vpop.f32.mrb[7].mxu0  ;;  %v633_v27 = vmax.f32 %v607_v24, 0.0  ;;  %v2462_v24 = vmov 0  }
 0x102   : > { %v2063_v11 = vpop.f32.mrb[6].mxu1  ;;  %2086 = vmatprep.mubr.msk.f32.mxu1 %vm426_vm0, %v624_v6  ;;  %v572_v12 = vadd.f32 %v1873_v46, %v571_v10  ;;  %v632_v25 = vmax.f32 %v602_v22, 0.0 }
 0x103   : > { %v611_v13 = vpop.f32.mrb[7].mxu1  ;;  %2087 = vmatmul.mubr.msk.f32.gmra.mrb[12].mxu1 %vm426_vm0, %v625_v5  ;;  %v627_v14 = vmax.f32 %v577_v9, 0.0  ;;  %v617_v28 = vadd.f32 %v2063_v11, %v1873_v46 }
 0x104   : > { %v626_v16 = vmax.f32 %v572_v12, 0.0  ;;  %v612_v26 = vadd.f32 %v1873_v46, %v611_v13 }
 0x105   : > { %v635_v30 = vmax.f32 %v617_v28, 0.0 }
 0x106   : > { %2089 = vmatprep.mubr.msk.f32.mxu1 %vm426_vm0, %v626_v16  ;;  %v634_v29 = vmax.f32 %v612_v26, 0.0 }
 0x107   : > { %2090 = vmatmul.mubr.msk.f32.gmra.mrb[14].mxu1 %vm426_vm0, %v627_v14 }
 0x108   : > { %2092 = vmatprep.mubr.msk.f32.mxu1 %vm426_vm0, %v628_v17 }
 0x10b   : > { %2093 = vmatmul.mubr.msk.f32.gmra.mrb[16].mxu1 %vm426_vm0, %v629_v19 }
 0x10c   : > { %2095 = vmatprep.mubr.msk.f32.mxu1 %vm426_vm0, %v630_v21 }
 0x10f   : > { %2096 = vmatmul.mubr.msk.f32.gmra.mrb[18].mxu1 %vm426_vm0, %v631_v23 }
 0x110   : > { %2098 = vmatprep.mubr.msk.f32.mxu1 %vm426_vm0, %v632_v25  ;;  %v2754_v25 = vld [vmem:[%s3092_s6] ss:$0 sm:$0xff] }
 0x113   : > { %2099 = vmatmul.mubr.msk.f32.gmra.mrb[20].mxu1 %vm426_vm0, %v633_v27 }
 0x114   : > { %2101 = vmatprep.mubr.msk.f32.mxu1 %vm426_vm0, %v634_v29 }
 0x117   : > { %2102 = vmatmul.mubr.msk.f32.gmra.mrb[22].mxu1 %vm426_vm0, %v635_v30 }
 0x118   : > { %1232 = vmatprep.mubr.bf16.mxu1 %v2462_v24 }
 0x1ce   : > { %v2082_v37 = vpop.f32.mrb[8].mxu1 }
 0x1cf   : > { %v771_v38 = vadd.f32 %v2082_v37, %v2706_v36  ;;  %v765_v39 = vpop.f32.mrb[9].mxu1 }
 0x1d0   : > { %v766_v40 = vadd.f32 %v2706_v36, %v765_v39 }
 0x1d1   : > { %v845_v44 = vmax.f32 %v771_v38, 0.0 }
 0x1d2   : > { %v844_v41 = vmax.f32 %v766_v40, 0.0  ;;  %v2085_v42 = vpop.f32.mrb[10].mxu1 }
 0x1d3   : > { %v781_v45 = vadd.f32 %v2085_v42, %v2706_v36  ;;  %v775_v46 = vpop.f32.mrb[11].mxu1 }
 0x1d4   : > { %v776_v48 = vadd.f32 %v2706_v36, %v775_v46  ;;  %2112 = vmatprep.mubr.msk.f32.mxu0 %vm871_vm1, %v844_v41 }
 0x1d5   : > { %v847_v49 = vmax.f32 %v781_v45, 0.0  ;;  %2113 = vmatmul.mubr.msk.f32.vlgmr.msra.gmra.mrb[8].mxu0 %vm871_vm1, %v845_v44 }
 0x1d6   : > { %v846_v50 = vmax.f32 %v776_v48, 0.0  ;;  %v2088_v51 = vpop.f32.mrb[12].mxu1  ;;  %1314 = vmatpush1.bf16.msra.mxu0 %v2245_v43 }
 0x1d7   : > { %v791_v53 = vadd.f32 %v2088_v51, %v2706_v36  ;;  %v785_v54 = vpop.f32.mrb[13].mxu1  ;;  %1315 = vmatprep.subr.bf16.mxu0 %v2253_v47 }
 0x1d8   : > { %2115 = vmatprep.mubr.msk.f32.mxu0 %vm871_vm1, %v846_v50  ;;  %v786_v55 = vadd.f32 %v2706_v36, %v785_v54 }
 0x1d9   : > { %v849_v56 = vmax.f32 %v791_v53, 0.0  ;;  %2116 = vmatmul.mubr.msk.f32.gmra.mrb[10].mxu0 %vm871_vm1, %v847_v49 }
 0x1da   : > { %v848_v57 = vmax.f32 %v786_v55, 0.0  ;;  %v2091_v58 = vpop.f32.mrb[14].mxu1  ;;  %1316 = vmatpush1.bf16.msra.mxu0 %v2251_v52 }
 0x1db   : > { %v801_v59 = vadd.f32 %v2091_v58, %v2706_v36  ;;  %v795_v60 = vpop.f32.mrb[15].mxu1 }
 0x1dc   : > { %2118 = vmatprep.mubr.msk.f32.mxu0 %vm871_vm1, %v848_v57  ;;  %v796_v61 = vadd.f32 %v2706_v36, %v795_v60 }
 0x1dd   : > { %2119 = vmatmul.mubr.msk.f32.gmra.mrb[12].mxu0 %vm871_vm1, %v849_v56  ;;  %v851_v62 = vmax.f32 %v801_v59, 0.0 }
 0x1de   : > { %v850_v63 = vmax.f32 %v796_v61, 0.0  ;;  %v2094_v0 = vpop.f32.mrb[16].mxu1 }
 0x1df   : > { %v811_v1 = vadd.f32 %v2094_v0, %v2706_v36  ;;  %v805_v2 = vpop.f32.mrb[17].mxu1 }
 0x1e0   : > { %2121 = vmatprep.mubr.msk.f32.mxu0 %vm871_vm1, %v850_v63  ;;  %v806_v3 = vadd.f32 %v2706_v36, %v805_v2 }
 0x1e1   : > { %2122 = vmatmul.mubr.msk.f32.gmra.mrb[14].mxu0 %vm871_vm1, %v851_v62  ;;  %v853_v4 = vmax.f32 %v811_v1, 0.0 }
 0x1e2   : > { %v852_v5 = vmax.f32 %v806_v3, 0.0  ;;  %v2097_v6 = vpop.f32.mrb[18].mxu1 }
 0x1e3   : > { %v821_v7 = vadd.f32 %v2097_v6, %v2706_v36  ;;  %v815_v8 = vpop.f32.mrb[19].mxu1 }
 0x1e4   : > { %2124 = vmatprep.mubr.msk.f32.mxu0 %vm871_vm1, %v852_v5  ;;  %v816_v9 = vadd.f32 %v2706_v36, %v815_v8 }
 0x1e5   : > { %2125 = vmatmul.mubr.msk.f32.gmra.mrb[16].mxu0 %vm871_vm1, %v853_v4  ;;  %v855_v10 = vmax.f32 %v821_v7, 0.0 }
 0x1e6   : > { %v854_v11 = vmax.f32 %v816_v9, 0.0  ;;  %v2100_v12 = vpop.f32.mrb[20].mxu1 }
 0x1e7   : > { %v831_v13 = vadd.f32 %v2100_v12, %v2706_v36  ;;  %v825_v14 = vpop.f32.mrb[21].mxu1 }
 0x1e8   : > { %2127 = vmatprep.mubr.msk.f32.mxu0 %vm871_vm1, %v854_v11  ;;  %v826_v15 = vadd.f32 %v2706_v36, %v825_v14 }
 0x1e9   : > { %2128 = vmatmul.mubr.msk.f32.gmra.mrb[18].mxu0 %vm871_vm1, %v855_v10  ;;  %v857_v16 = vmax.f32 %v831_v13, 0.0 }
 0x1ea   : > { %v856_v17 = vmax.f32 %v826_v15, 0.0  ;;  %v2103_v18 = vpop.f32.mrb[22].mxu1 }
 0x1eb   : > { %v841_v19 = vadd.f32 %v2103_v18, %v2706_v36  ;;  %v835_v20 = vpop.f32.mrb[23].mxu1 }
 0x1ec   : > { %2130 = vmatprep.mubr.msk.f32.mxu0 %vm871_vm1, %v856_v17  ;;  %v836_v21 = vadd.f32 %v2706_v36, %v835_v20 }
 0x1ed   : > { %2131 = vmatmul.mubr.msk.f32.gmra.mrb[20].mxu0 %vm871_vm1, %v857_v16  ;;  %v859_v22 = vmax.f32 %v841_v19, 0.0 }
 0x1ee   : > { %v858_v23 = vmax.f32 %v836_v21, 0.0 }
 0x1f0   : > { %2133 = vmatprep.mubr.msk.f32.mxu0 %vm871_vm1, %v858_v23 }
 0x1f1   : > { %2134 = vmatmul.mubr.msk.f32.gmra.mrb[22].mxu0 %vm871_vm1, %v859_v22 }
 0x1f2   : > { %1345 = vmatprep.mubr.bf16.mxu0 %v2462_v24 }
 0x2a8   : > { %v2114_v26 = vpop.f32.mrb[8].mxu0 }
 0x2a9   : > { %v992_v27 = vadd.f32 %v2114_v26, %v2754_v25  ;;  %v986_v28 = vpop.f32.mrb[9].mxu0 }
 0x2aa   : > { %v987_v29 = vadd.f32 %v2754_v25, %v986_v28 }
 0x2ab   : > { %v1066_v30 = vmax.f32 %v992_v27, 0.0  ;;  %v1115_v27 = vlaneseq }
 0x2ac   : > { %v1065_v31 = vmax.f32 %v987_v29, 0.0  ;;  %v2117_v32 = vpop.f32.mrb[10].mxu0 }
 0x2ad   : > { %v1002_v33 = vadd.f32 %v2117_v32, %v2754_v25  ;;  %v996_v34 = vpop.f32.mrb[11].mxu0  ;;  %v1116_v28 = vshrl.u32 %v1115_v27, 7 }
 0x2ae   : > { %v1081_v35 = vpack.c.bf16 %v1066_v30, %v1065_v31  ;;  %v997_v36 = vadd.f32 %v2754_v25, %v996_v34  ;;  %v1113_v31 = vld [vmem:[%s3094_s8] sm:$0xf] }
 0x2af   : > { %v1068_v37 = vmax.f32 %v1002_v33, 0.0  ;;  %v1117_v29 = vsub.s32 0, %v1116_v28  ;;  %v1125_v30 = vsub.s32 2, %v1116_v28  ;;  %v1121_v32 = vsub.s32 1, %v1116_v28 }
 0x2b0   : > { %1089 = vst.msk [vmem:[#allocation2] sm:$0xff] %vm871_vm1, %v1081_v35  ;;  %v1067_v38 = vmax.f32 %v997_v36, 0.0  ;;  %v2120_v39 = vpop.f32.mrb[12].mxu0  ;;  %v1129_v33 = vsub.s32 3, %v1116_v28 }
 0x2b1   : > { %v1012_v40 = vadd.f32 %v2120_v39, %v2754_v25  ;;  %v1006_v41 = vpop.f32.mrb[13].mxu0  ;;  %v2813_v34 = vrot.slane %v1113_v31, %v1117_v29  ;;  %v2815_v35 = vrot.slane %v1113_v31, %v1125_v30 }
 0x2b2   : > { %v1082_v42 = vpack.c.bf16 %v1068_v37, %v1067_v38  ;;  %v1007_v43 = vadd.f32 %v2754_v25, %v1006_v41  ;;  %v2819_v36 = vrot.slane %v1113_v31, %v1129_v33 }
 0x2b3   : > { %v1070_v44 = vmax.f32 %v1012_v40, 0.0 }
 0x2b4   : > { %1090 = vst.msk [vmem:[#allocation2 + $0x8] sm:$0xff] %vm871_vm1, %v1082_v42  ;;  %v1069_v45 = vmax.f32 %v1007_v43, 0.0  ;;  %v2123_v46 = vpop.f32.mrb[14].mxu0 }
 0x2b5   : > { %v1022_v47 = vadd.f32 %v2123_v46, %v2754_v25  ;;  %v1016_v48 = vpop.f32.mrb[15].mxu0 }
 0x2b6   : > { %v1083_v49 = vpack.c.bf16 %v1070_v44, %v1069_v45  ;;  %v1017_v50 = vadd.f32 %v2754_v25, %v1016_v48 }
 0x2b7   : > { %v1097_v51 = vld [vmem:[#allocation2] sm:$0xff]  ;;  %v1072_v52 = vmax.f32 %v1022_v47, 0.0 }
 0x2b8   : > { %1091 = vst.msk [vmem:[#allocation2 + $0x10] sm:$0xff] %vm871_vm1, %v1083_v49  ;;  %1932 = vmatmul.mubr.msk.bf16.vlgmr.msra.gmra.mrb[24].mxu1 %vm871_vm1, %v1097_v51  ;;  %1940 = vmatmul.mubr.msk.bf16.vlgmr.msra.gmra.mrb[24].mxu0 %vm871_vm1, %v1097_v51  ;;  %v1071_v53 = vmax.f32 %v1017_v50, 0.0  ;;  %v2126_v54 = vpop.f32.mrb[16].mxu0 }
 0x2b9   : > { %1242 = vmatprep.mubr.bf16.mxu1 %v2462_v24  ;;  %1355 = vmatprep.mubr.bf16.mxu0 %v2462_v24  ;;  %v1032_v55 = vadd.f32 %v2126_v54, %v2754_v25  ;;  %v1026_v56 = vpop.f32.mrb[17].mxu0 }
 0x2ba   : > { %v1084_v57 = vpack.c.bf16 %v1072_v52, %v1071_v53  ;;  %v1027_v58 = vadd.f32 %v2754_v25, %v1026_v56 }
 0x2bb   : > { %v1074_v59 = vmax.f32 %v1032_v55, 0.0  ;;  %v1098_v2 = vld [vmem:[#allocation2 + $0x8] sm:$0xff] }
 0x2bc   : > { %1092 = vst.msk [vmem:[#allocation2 + $0x18] sm:$0xff] %vm871_vm1, %v1084_v57  ;;  %v1073_v60 = vmax.f32 %v1027_v58, 0.0  ;;  %v2129_v61 = vpop.f32.mrb[18].mxu0 }
 0x2bd   : > { %v1042_v62 = vadd.f32 %v2129_v61, %v2754_v25  ;;  %v1036_v63 = vpop.f32.mrb[19].mxu0 }
 0x2be   : > { %v1085_v0 = vpack.c.bf16 %v1074_v59, %v1073_v60  ;;  %v1037_v1 = vadd.f32 %v2754_v25, %v1036_v63 }
 0x2bf   : > { %v1076_v3 = vmax.f32 %v1042_v62, 0.0  ;;  %v1099_v17 = vld [vmem:[#allocation2 + $0x10] sm:$0xff] }
 0x2c0   : > { %1933 = vmatmul.mubr.msk.bf16.gmra.mrb[28].mxu1 %vm871_vm1, %v1098_v2  ;;  %1941 = vmatmul.mubr.msk.bf16.gmra.mrb[28].mxu0 %vm871_vm1, %v1098_v2  ;;  %1093 = vst.msk [vmem:[#allocation2 + $0x20] sm:$0xff] %vm871_vm1, %v1085_v0  ;;  %v1075_v4 = vmax.f32 %v1037_v1, 0.0  ;;  %v2132_v5 = vpop.f32.mrb[20].mxu0 }
 0x2c1   : > { %1252 = vmatprep.mubr.bf16.mxu1 %v2462_v24  ;;  %1365 = vmatprep.mubr.bf16.mxu0 %v2462_v24  ;;  %v1052_v6 = vadd.f32 %v2132_v5, %v2754_v25  ;;  %v1046_v7 = vpop.f32.mrb[21].mxu0 }
 0x2c2   : > { %v1086_v8 = vpack.c.bf16 %v1076_v3, %v1075_v4  ;;  %v1047_v9 = vadd.f32 %v2754_v25, %v1046_v7 }
 0x2c3   : > { %v1078_v10 = vmax.f32 %v1052_v6, 0.0  ;;  %v1100_v21 = vld [vmem:[#allocation2 + $0x18] sm:$0xff] }
 0x2c4   : > { %1094 = vst.msk [vmem:[#allocation2 + $0x28] sm:$0xff] %vm871_vm1, %v1086_v8  ;;  %v1077_v11 = vmax.f32 %v1047_v9, 0.0  ;;  %v2135_v12 = vpop.f32.mrb[22].mxu0 }
 0x2c5   : > { %v1062_v13 = vadd.f32 %v2135_v12, %v2754_v25  ;;  %v1056_v14 = vpop.f32.mrb[23].mxu0 }
 0x2c6   : > { %v1087_v15 = vpack.c.bf16 %v1078_v10, %v1077_v11  ;;  %v1057_v16 = vadd.f32 %v2754_v25, %v1056_v14 }
 0x2c7   : > { %v1080_v18 = vmax.f32 %v1062_v13, 0.0  ;;  %v1101_v22 = vld [vmem:[#allocation2 + $0x20] sm:$0xff] }
 0x2c8   : > { %1934 = vmatmul.mubr.msk.bf16.gmra.mrb[32].mxu1 %vm871_vm1, %v1099_v17  ;;  %1942 = vmatmul.mubr.msk.bf16.gmra.mrb[32].mxu0 %vm871_vm1, %v1099_v17  ;;  %1095 = vst.msk [vmem:[#allocation2 + $0x30] sm:$0xff] %vm871_vm1, %v1087_v15  ;;  %v1079_v19 = vmax.f32 %v1057_v16, 0.0 }
 0x2c9   : > { %1262 = vmatprep.mubr.bf16.mxu1 %v2462_v24  ;;  %1375 = vmatprep.mubr.bf16.mxu0 %v2462_v24 }
 0x2ca   : > { %v1088_v20 = vpack.c.bf16 %v1080_v18, %v1079_v19 }
 0x2cb   : > { %v1102_v23 = vld [vmem:[#allocation2 + $0x28] sm:$0xff] }
 0x2cc   : > { %1096 = vst.msk [vmem:[#allocation2 + $0x38] sm:$0xff] %vm871_vm1, %v1088_v20 }
 0x2cf   : > { %v1103_v25 = vld [vmem:[#allocation2 + $0x30] sm:$0xff] }
 0x2d0   : > { %1935 = vmatmul.mubr.msk.bf16.gmra.mrb[36].mxu1 %vm871_vm1, %v1100_v21  ;;  %1943 = vmatmul.mubr.msk.bf16.gmra.mrb[36].mxu0 %vm871_vm1, %v1100_v21 }
 0x2d1   : > { %1272 = vmatprep.mubr.bf16.mxu1 %v2462_v24  ;;  %1385 = vmatprep.mubr.bf16.mxu0 %v2462_v24 }
 0x2d3   : > { %v1104_v26 = vld [vmem:[#allocation2 + $0x38] sm:$0xff] }
 0x2d8   : > { %1936 = vmatmul.mubr.msk.bf16.gmra.mrb[40].mxu1 %vm871_vm1, %v1101_v22  ;;  %1944 = vmatmul.mubr.msk.bf16.gmra.mrb[40].mxu0 %vm871_vm1, %v1101_v22 }
 0x2d9   : > { %1282 = vmatprep.mubr.bf16.mxu1 %v2462_v24  ;;  %1395 = vmatprep.mubr.bf16.mxu0 %v2462_v24 }
 0x2e0   : > { %1937 = vmatmul.mubr.msk.bf16.gmra.mrb[44].mxu1 %vm871_vm1, %v1102_v23  ;;  %1945 = vmatmul.mubr.msk.bf16.gmra.mrb[44].mxu0 %vm871_vm1, %v1102_v23 }
 0x2e1   : > { %1292 = vmatprep.mubr.bf16.mxu1 %v2462_v24  ;;  %1405 = vmatprep.mubr.bf16.mxu0 %v2462_v24 }
 0x2e8   : > { %1938 = vmatmul.mubr.msk.bf16.gmra.mrb[48].mxu1 %vm871_vm1, %v1103_v25  ;;  %1946 = vmatmul.mubr.msk.bf16.gmra.mrb[48].mxu0 %vm871_vm1, %v1103_v25 }
 0x2e9   : > { %1302 = vmatprep.mubr.bf16.mxu1 %v2462_v24  ;;  %1415 = vmatprep.mubr.bf16.mxu0 %v2462_v24  ;;  %v2817_v24 = vrot.slane %v1113_v31, %v1121_v32 }
 0x2f0   : > { %1939 = vmatmul.mubr.msk.bf16.gmra.mrb[52].mxu1 %vm871_vm1, %v1104_v26  ;;  %1947 = vmatmul.mubr.msk.bf16.gmra.mrb[52].mxu0 %vm871_vm1, %v1104_v26 }
 0x38b   : > { %v1234_v37 = vpop.f32.mrb[24].mxu1  ;;  %v1347_v38 = vpop.f32.mrb[24].mxu0 }
 0x38c   : > { %v1235_v39 = vadd.f32 %v1234_v37, %v2813_v34  ;;  %v1348_v40 = vadd.f32 %v1347_v38, %v2815_v35  ;;  %v1236_v41 = vpop.f32.mrb[25].mxu1  ;;  %v1349_v42 = vpop.f32.mrb[25].mxu0 }
 0x38d   : > { %v1237_v43 = vadd.f32 %v1236_v41, %v2817_v24  ;;  %v1350_v44 = vadd.f32 %v1349_v42, %v2819_v36  ;;  %v1238_v45 = vpop.f32.mrb[26].mxu1  ;;  %v1351_v46 = vpop.f32.mrb[26].mxu0 }
 0x38e   : > { %v1426_v47 = vmul.f32 0.5, %v1235_v39  ;;  %v1428_v48 = vmul.f32 0.5, %v1348_v40  ;;  %v1239_v49 = vadd.f32 %v1238_v45, %v2813_v34  ;;  %v1352_v50 = vadd.f32 %v1351_v46, %v2815_v35  ;;  %v1240_v51 = vpop.f32.mrb[27].mxu1  ;;  %v1353_v52 = vpop.f32.mrb[27].mxu0 }
 0x38f   : > { %v1427_v53 = vmul.f32 0.5, %v1237_v43  ;;  %v1429_v54 = vmul.f32 0.5, %v1350_v44  ;;  %v1241_v55 = vadd.f32 %v1240_v51, %v2817_v24  ;;  %v1354_v56 = vadd.f32 %v1353_v52, %v2819_v36 }
 0x390   : > { %2254 = vtanh.f32 %v1426_v47  ;;  %v1430_v57 = vmul.f32 0.5, %v1239_v49  ;;  %v1432_v58 = vmul.f32 0.5, %v1352_v50 }
 0x391   : > { %2256 = vtanh.f32 %v1428_v48  ;;  %v1431_v59 = vmul.f32 0.5, %v1241_v55  ;;  %v1433_v60 = vmul.f32 0.5, %v1354_v56 }
 0x392   : > { %2258 = vtanh.f32 %v1427_v53 }
 0x393   : > { %2260 = vtanh.f32 %v1429_v54  ;;  %v1244_v61 = vpop.f32.mrb[28].mxu1  ;;  %v1357_v62 = vpop.f32.mrb[28].mxu0 }
 0x394   : > { %2262 = vtanh.f32 %v1430_v57  ;;  %v1245_v63 = vadd.f32 %v1244_v61, %v2813_v34  ;;  %v1358_v0 = vadd.f32 %v1357_v62, %v2815_v35  ;;  %v1246_v1 = vpop.f32.mrb[29].mxu1  ;;  %v1359_v2 = vpop.f32.mrb[29].mxu0 }
 0x395   : > { %2264 = vtanh.f32 %v1432_v58  ;;  %v1247_v3 = vadd.f32 %v1246_v1, %v2817_v24  ;;  %v1360_v4 = vadd.f32 %v1359_v2, %v2819_v36  ;;  %v1248_v5 = vpop.f32.mrb[30].mxu1  ;;  %v1361_v6 = vpop.f32.mrb[30].mxu0 }
 0x396   : > { %2266 = vtanh.f32 %v1431_v59  ;;  %v1434_v7 = vmul.f32 0.5, %v1245_v63  ;;  %v1436_v8 = vmul.f32 0.5, %v1358_v0  ;;  %v1249_v9 = vadd.f32 %v1248_v5, %v2813_v34  ;;  %v1250_v10 = vpop.f32.mrb[31].mxu1  ;;  %v1363_v11 = vpop.f32.mrb[31].mxu0 }
 0x397   : > { %2268 = vtanh.f32 %v1433_v60  ;;  %v1435_v12 = vmul.f32 0.5, %v1247_v3  ;;  %v1437_v13 = vmul.f32 0.5, %v1360_v4  ;;  %v1362_v14 = vadd.f32 %v1361_v6, %v2815_v35 }
 0x398   : > { %2270 = vtanh.f32 %v1434_v7  ;;  %v1438_v15 = vmul.f32 0.5, %v1249_v9  ;;  %v1251_v16 = vadd.f32 %v1250_v10, %v2817_v24  ;;  %v1364_v17 = vadd.f32 %v1363_v11, %v2819_v36 }
 0x399   : > { %2272 = vtanh.f32 %v1436_v8  ;;  %v1440_v18 = vmul.f32 0.5, %v1362_v14 }
 0x39a   : > { %v2255_v19 = vpop.eup %2254  ;;  %2274 = vtanh.f32 %v1435_v12  ;;  %v1439_v20 = vmul.f32 0.5, %v1251_v16  ;;  %v1441_v23 = vmul.f32 0.5, %v1364_v17 }
 0x39b   : > { %v2257_v21 = vpop.eup %2256  ;;  %v1554_v22 = vadd.f32 1.0, %v2255_v19  ;;  %2276 = vtanh.f32 %v1437_v13  ;;  %v1254_v25 = vpop.f32.mrb[32].mxu1 }
 0x39c   : > { %v1367_v26 = vpop.f32.mrb[32].mxu0  ;;  %v2259_v27 = vpop.eup %2258  ;;  %v1556_v28 = vadd.f32 1.0, %v2257_v21  ;;  %2278 = vtanh.f32 %v1438_v15  ;;  %v1255_v29 = vadd.f32 %v1254_v25, %v2813_v34 }
 0x39d   : > { %v1368_v30 = vadd.f32 %v1367_v26, %v2815_v35  ;;  %v1256_v31 = vpop.f32.mrb[33].mxu1  ;;  %v1369_v32 = vpop.f32.mrb[33].mxu0  ;;  %v1618_v37 = vmul.f32 0.5, %v1554_v22  ;;  %v1555_v38 = vadd.f32 1.0, %v2259_v27  ;;  %2280 = vtanh.f32 %v1440_v18 }
 0x39e   : > { %v2261_v33 = vpop.eup %2260  ;;  %v1257_v39 = vadd.f32 %v1256_v31, %v2817_v24  ;;  %v1258_v40 = vpop.f32.mrb[34].mxu1  ;;  %v1620_v43 = vmul.f32 0.5, %v1556_v28  ;;  %2282 = vtanh.f32 %v1439_v20  ;;  %v1442_v45 = vmul.f32 0.5, %v1255_v29 }
 0x39f   : > { %v1371_v41 = vpop.f32.mrb[34].mxu0  ;;  %v2263_v42 = vpop.eup %2262  ;;  %v1557_v44 = vadd.f32 1.0, %v2261_v33  ;;  %1682 = vst [vmem:[%s2848_s15] sm:$0xff] %v1618_v37  ;;  %v1619_v49 = vmul.f32 0.5, %v1555_v38  ;;  %2284 = vtanh.f32 %v1441_v23  ;;  %v1444_v51 = vmul.f32 0.5, %v1368_v30 }
 0x3a0   : > { %v1260_v46 = vpop.f32.mrb[35].mxu1  ;;  %v2845_v47 = vpop.f32.mrb[35].mxu0  ;;  %v1558_v50 = vadd.f32 1.0, %v2263_v42  ;;  %1684 = vst [vmem:[%s2848_s15 + $0x10] sm:$0xff] %v1620_v43  ;;  %2286 = vtanh.f32 %v1442_v45  ;;  %v1443_v55 = vmul.f32 0.5, %v1257_v39  ;;  %v1370_v59 = vadd.f32 %v1369_v32, %v2819_v36 }
 0x3a1   : > { %v2265_v48 = vpop.eup %2264  ;;  %v1621_v53 = vmul.f32 0.5, %v1557_v44  ;;  %1683 = vst [vmem:[%s2848_s15 + $0x8] sm:$0xff] %v1619_v49  ;;  %2288 = vtanh.f32 %v1444_v51  ;;  %v1259_v63 = vadd.f32 %v1258_v40, %v2813_v34  ;;  %v1372_v4 = vadd.f32 %v1371_v41, %v2815_v35 }
 0x3a2   : > { %v2267_v52 = vpop.eup %2266  ;;  %v1560_v54 = vadd.f32 1.0, %v2265_v48  ;;  %v1622_v57 = vmul.f32 0.5, %v1558_v50  ;;  %2290 = vtanh.f32 %v1443_v55  ;;  %v1445_v3 = vmul.f32 0.5, %v1370_v59 }
 0x3a3   : > { %v2269_v56 = vpop.eup %2268  ;;  %v1559_v58 = vadd.f32 1.0, %v2267_v52  ;;  %1685 = vst [vmem:[%s2848_s15 + $0x18] sm:$0xff] %v1621_v53  ;;  %v1264_v5 = vpop.f32.mrb[36].mxu1  ;;  %v1446_v10 = vmul.f32 0.5, %v1259_v63  ;;  %v1261_v11 = vadd.f32 %v1260_v46, %v2817_v24  ;;  %v1448_v17 = vmul.f32 0.5, %v1372_v4 }
 0x3a4   : > { %v2271_v60 = vpop.eup %2270  ;;  %v1624_v61 = vmul.f32 0.5, %v1560_v54  ;;  %v1561_v62 = vadd.f32 1.0, %v2269_v56  ;;  %1686 = vst [vmem:[%s2848_s15 + $0x20] sm:$0xff] %v1622_v57  ;;  %v1377_v6 = vpop.f32.mrb[36].mxu0  ;;  %2292 = vtanh.f32 %v1445_v3  ;;  %v1374_v30 = vadd.f32 %v2845_v47, %v2819_v36 }
 0x3a5   : > { %v2273_v0 = vpop.eup %2272  ;;  %v1623_v1 = vmul.f32 0.5, %v1559_v58  ;;  %v1562_v2 = vadd.f32 1.0, %v2271_v60  ;;  %v1266_v12 = vpop.f32.mrb[37].mxu1  ;;  %2294 = vtanh.f32 %v1446_v10  ;;  %v1447_v23 = vmul.f32 0.5, %v1261_v11 }
 0x3a6   : > { %v2275_v7 = vpop.eup %2274  ;;  %1688 = vst [vmem:[%s2848_s15 + $0x30] sm:$0xff] %v1624_v61  ;;  %v1625_v8 = vmul.f32 0.5, %v1561_v62  ;;  %v1564_v9 = vadd.f32 1.0, %v2273_v0  ;;  %v1379_v13 = vpop.f32.mrb[37].mxu0  ;;  %2296 = vtanh.f32 %v1448_v17  ;;  %v1265_v37 = vadd.f32 %v1264_v5, %v2813_v34 }
 0x3a7   : > { %v2277_v14 = vpop.eup %2276  ;;  %1687 = vst [vmem:[%s2848_s15 + $0x28] sm:$0xff] %v1623_v1  ;;  %v1626_v15 = vmul.f32 0.5, %v1562_v2  ;;  %v1563_v16 = vadd.f32 1.0, %v2275_v7  ;;  %v1268_v18 = vpop.f32.mrb[38].mxu1  ;;  %2298 = vtanh.f32 %v1447_v23  ;;  %v1449_v41 = vmul.f32 0.5, %v1374_v30 }
 0x3a8   : > { %v1381_v19 = vpop.f32.mrb[38].mxu0  ;;  %v2279_v20 = vpop.eup %2278  ;;  %1689 = vst [vmem:[%s2848_s15 + $0x38] sm:$0xff] %v1625_v8  ;;  %v1628_v21 = vmul.f32 0.5, %v1564_v9  ;;  %v1565_v22 = vadd.f32 1.0, %v2277_v14  ;;  %v1378_v42 = vadd.f32 %v1377_v6, %v2815_v35  ;;  %v1450_v46 = vmul.f32 0.5, %v1265_v37 }
 0x3a9   : > { %v1270_v25 = vpop.f32.mrb[39].mxu1  ;;  %v1383_v26 = vpop.f32.mrb[39].mxu0  ;;  %1690 = vst [vmem:[%s2848_s15 + $0x40] sm:$0xff] %v1626_v15  ;;  %v1627_v28 = vmul.f32 0.5, %v1563_v16  ;;  %v1566_v29 = vadd.f32 1.0, %v2279_v20  ;;  %v1267_v47 = vadd.f32 %v1266_v12, %v2817_v24  ;;  %2300 = vtanh.f32 %v1449_v41 }
 0x3aa   : > { %v2281_v27 = vpop.eup %2280  ;;  %1692 = vst [vmem:[%s2848_s15 + $0x50] sm:$0xff] %v1628_v21  ;;  %v1629_v32 = vmul.f32 0.5, %v1565_v22  ;;  %v1452_v51 = vmul.f32 0.5, %v1378_v42  ;;  %2302 = vtanh.f32 %v1450_v46  ;;  %v1380_v62 = vadd.f32 %v1379_v13, %v2819_v36 }
 0x3ab   : > { %v2283_v31 = vpop.eup %2282  ;;  %v1568_v33 = vadd.f32 1.0, %v2281_v27  ;;  %1691 = vst [vmem:[%s2848_s15 + $0x48] sm:$0xff] %v1627_v28  ;;  %v1630_v39 = vmul.f32 0.5, %v1566_v29  ;;  %v1274_v52 = vpop.f32.mrb[40].mxu1  ;;  %v1451_v57 = vmul.f32 0.5, %v1267_v47  ;;  %v1269_v2 = vadd.f32 %v1268_v18, %v2813_v34 }
 0x3ac   : > { %v2285_v38 = vpop.eup %2284  ;;  %v1567_v40 = vadd.f32 1.0, %v2283_v31  ;;  %1693 = vst [vmem:[%s2848_s15 + $0x58] sm:$0xff] %v1629_v32  ;;  %v1387_v53 = vpop.f32.mrb[40].mxu0  ;;  %2304 = vtanh.f32 %v1452_v51  ;;  %v1382_v3 = vadd.f32 %v1381_v19, %v2815_v35  ;;  %v1453_v8 = vmul.f32 0.5, %v1380_v62 }
 0x3ad   : > { %v2287_v43 = vpop.eup %2286  ;;  %v1632_v44 = vmul.f32 0.5, %v1568_v33  ;;  %v1569_v45 = vadd.f32 1.0, %v2285_v38  ;;  %1694 = vst [vmem:[%s2848_s15 + $0x60] sm:$0xff] %v1630_v39  ;;  %v1276_v58 = vpop.f32.mrb[41].mxu1  ;;  %2306 = vtanh.f32 %v1451_v57  ;;  %v1271_v9 = vadd.f32 %v1270_v25, %v2817_v24 }
 0x3ae   : > { %v2289_v48 = vpop.eup %2288  ;;  %v1631_v49 = vmul.f32 0.5, %v1567_v40  ;;  %v1570_v50 = vadd.f32 1.0, %v2287_v43  ;;  %v1389_v59 = vpop.f32.mrb[41].mxu0  ;;  %v1384_v10 = vadd.f32 %v1383_v26, %v2819_v36  ;;  %v1454_v13 = vmul.f32 0.5, %v1269_v2 }
 0x3af   : > { %v2291_v54 = vpop.eup %2290  ;;  %1696 = vst [vmem:[%s2848_s15 + $0x70] sm:$0xff] %v1632_v44  ;;  %v1633_v55 = vmul.f32 0.5, %v1569_v45  ;;  %v1572_v56 = vadd.f32 1.0, %v2289_v48  ;;  %v1278_v63 = vpop.f32.mrb[42].mxu1  ;;  %v1456_v14 = vmul.f32 0.5, %v1382_v3  ;;  %v1275_v15 = vadd.f32 %v1274_v52, %v2813_v34 }
 0x3b0   : > { %1695 = vst [vmem:[%s2848_s15 + $0x68] sm:$0xff] %v1631_v49  ;;  %v1634_v60 = vmul.f32 0.5, %v1570_v50  ;;  %v1571_v61 = vadd.f32 1.0, %v2291_v54  ;;  %v2875_v0 = vpop.f32.mrb[42].mxu0  ;;  %v2880_v4 = vpop.f32.mrb[43].mxu1  ;;  %2308 = vtanh.f32 %v1453_v8  ;;  %v1455_v18 = vmul.f32 0.5, %v1271_v9 }
 0x3b1   : > { %1697 = vst [vmem:[%s2848_s15 + $0x78] sm:$0xff] %v1633_v55  ;;  %v1636_v1 = vmul.f32 0.5, %v1572_v56  ;;  %v2882_v5 = vpop.f32.mrb[43].mxu0  ;;  %v2293_v6 = vpop.eup %2292  ;;  %v1457_v19 = vmul.f32 0.5, %v1384_v10  ;;  %2310 = vtanh.f32 %v1454_v13  ;;  %v1458_v23 = vmul.f32 0.5, %v1275_v15 }
 0x3b2   : > { %1698 = vst [vmem:[%s2848_s15 + $0x80] sm:$0xff] %v1634_v60  ;;  %v1635_v7 = vmul.f32 0.5, %v1571_v61  ;;  %v2295_v11 = vpop.eup %2294  ;;  %v1573_v12 = vadd.f32 1.0, %v2293_v6  ;;  %2312 = vtanh.f32 %v1456_v14  ;;  %v1388_v27 = vadd.f32 %v1387_v53, %v2815_v35 }
 0x3b3   : > { %1700 = vst [vmem:[%s2848_s15 + $0x90] sm:$0xff] %v1636_v1  ;;  %v2297_v16 = vpop.eup %2296  ;;  %v1574_v17 = vadd.f32 1.0, %v2295_v11  ;;  %v1284_v28 = vpop.f32.mrb[44].mxu1  ;;  %2314 = vtanh.f32 %v1455_v18  ;;  %v1277_v31 = vadd.f32 %v1276_v58, %v2817_v24  ;;  %v1390_v32 = vadd.f32 %v1389_v59, %v2819_v36 }
 0x3b4   : > { %1699 = vst [vmem:[%s2848_s15 + $0x88] sm:$0xff] %v1635_v7  ;;  %v2299_v20 = vpop.eup %2298  ;;  %v1637_v21 = vmul.f32 0.5, %v1573_v12  ;;  %v1576_v22 = vadd.f32 1.0, %v2297_v16  ;;  %v1397_v29 = vpop.f32.mrb[44].mxu0  ;;  %2316 = vtanh.f32 %v1457_v19  ;;  %v1460_v40 = vmul.f32 0.5, %v1388_v27 }
 0x3b5   : > { %v1638_v25 = vmul.f32 0.5, %v1574_v17  ;;  %v1575_v26 = vadd.f32 1.0, %v2299_v20  ;;  %v1286_v33 = vpop.f32.mrb[45].mxu1  ;;  %v1399_v37 = vpop.f32.mrb[45].mxu0  ;;  %v1279_v41 = vadd.f32 %v1278_v63, %v2813_v34  ;;  %2318 = vtanh.f32 %v1458_v23 }
 0x3b6   : > { %1701 = vst [vmem:[%s2848_s15 + $0x98] sm:$0xff] %v1637_v21  ;;  %v1640_v30 = vmul.f32 0.5, %v1576_v22  ;;  %v2301_v38 = vpop.eup %2300  ;;  %v2896_v42 = vpop.f32.mrb[46].mxu1  ;;  %v1459_v46 = vmul.f32 0.5, %v1277_v31  ;;  %v1461_v47 = vmul.f32 0.5, %v1390_v32  ;;  %2320 = vtanh.f32 %v1460_v40 }
 0x3b7   : > { %1702 = vst [vmem:[%s2848_s15 + $0xa0] sm:$0xff] %v1638_v25  ;;  %v1639_v39 = vmul.f32 0.5, %v1575_v26  ;;  %v2898_v43 = vpop.f32.mrb[46].mxu0  ;;  %v2303_v44 = vpop.eup %2302  ;;  %v1577_v45 = vadd.f32 1.0, %v2301_v38  ;;  %v1462_v52 = vmul.f32 0.5, %v1279_v41  ;;  %v1392_v53 = vadd.f32 %v2875_v0, %v2815_v35 }
 0x3b8   : > { %1704 = vst [vmem:[%s2848_s15 + $0xb0] sm:$0xff] %v1640_v30  ;;  %v2901_v48 = vpop.f32.mrb[47].mxu1  ;;  %v2903_v49 = vpop.f32.mrb[47].mxu0  ;;  %v1578_v51 = vadd.f32 1.0, %v2303_v44  ;;  %2322 = vtanh.f32 %v1459_v46  ;;  %v1281_v57 = vadd.f32 %v2880_v4, %v2817_v24  ;;  %v1394_v63 = vadd.f32 %v2882_v5, %v2819_v36 }
 0x3b9   : > { %v2305_v50 = vpop.eup %2304  ;;  %1703 = vst [vmem:[%s2848_s15 + $0xa8] sm:$0xff] %v1639_v39  ;;  %v1641_v55 = vmul.f32 0.5, %v1577_v45  ;;  %2324 = vtanh.f32 %v1461_v47  ;;  %v1464_v60 = vmul.f32 0.5, %v1392_v53  ;;  %v1285_v2 = vadd.f32 %v1284_v28, %v2813_v34 }
 0x3ba   : > { %v2307_v54 = vpop.eup %2306  ;;  %v1580_v56 = vadd.f32 1.0, %v2305_v50  ;;  %v1642_v58 = vmul.f32 0.5, %v1578_v51  ;;  %2326 = vtanh.f32 %v1462_v52  ;;  %v1463_v62 = vmul.f32 0.5, %v1281_v57 }
 0x3bb   : > { %v1579_v59 = vadd.f32 1.0, %v2307_v54  ;;  %1705 = vst [vmem:[%s2848_s15 + $0xb8] sm:$0xff] %v1641_v55  ;;  %v2309_v0 = vpop.eup %2308  ;;  %2328 = vtanh.f32 %v1464_v60  ;;  %v1398_v3 = vadd.f32 %v1397_v29, %v2815_v35  ;;  %v2916_v4 = vpop.f32.mrb[48].mxu1  ;;  %v1465_v9 = vmul.f32 0.5, %v1394_v63 }
 0x3bc   : > { %v1644_v61 = vmul.f32 0.5, %v1580_v56  ;;  %1706 = vst [vmem:[%s2848_s15 + $0xc0] sm:$0xff] %v1642_v58  ;;  %v2918_v6 = vpop.f32.mrb[48].mxu0  ;;  %v2311_v7 = vpop.eup %2310  ;;  %v1581_v8 = vadd.f32 1.0, %v2309_v0  ;;  %2330 = vtanh.f32 %v1463_v62  ;;  %v1287_v5 = vadd.f32 %v1286_v33, %v2817_v24 }
 0x3bd   : > { %v1643_v1 = vmul.f32 0.5, %v1579_v59  ;;  %v2922_v10 = vpop.f32.mrb[49].mxu1  ;;  %v2924_v11 = vpop.f32.mrb[49].mxu0  ;;  %v1582_v13 = vadd.f32 1.0, %v2311_v7  ;;  %v1466_v14 = vmul.f32 0.5, %v1285_v2  ;;  %v1468_v15 = vmul.f32 0.5, %v1398_v3 }
 0x3be   : > { %1708 = vst [vmem:[%s2848_s15 + $0xd0] sm:$0xff] %v1644_v61  ;;  %v2313_v12 = vpop.eup %2312  ;;  %v1400_v16 = vadd.f32 %v1399_v37, %v2819_v36  ;;  %v2928_v17 = vpop.f32.mrb[50].mxu1  ;;  %v1645_v20 = vmul.f32 0.5, %v1581_v8  ;;  %2332 = vtanh.f32 %v1465_v9  ;;  %v1467_v22 = vmul.f32 0.5, %v1287_v5 }
 0x3bf   : > { %1707 = vst [vmem:[%s2848_s15 + $0xc8] sm:$0xff] %v1643_v1  ;;  %v2930_v18 = vpop.f32.mrb[50].mxu0  ;;  %v2315_v19 = vpop.eup %2314  ;;  %v1584_v21 = vadd.f32 1.0, %v2313_v12  ;;  %v1646_v27 = vmul.f32 0.5, %v1582_v13  ;;  %2334 = vtanh.f32 %v1466_v14  ;;  %v1289_v33 = vadd.f32 %v2896_v42, %v2813_v34 }
 0x3c0   : > { %v2932_v23 = vpop.f32.mrb[51].mxu1  ;;  %v2934_v25 = vpop.f32.mrb[51].mxu0  ;;  %v1583_v28 = vadd.f32 1.0, %v2315_v19  ;;  %v1469_v29 = vmul.f32 0.5, %v1400_v16  ;;  %1709 = vst [vmem:[%s2848_s15 + $0xd8] sm:$0xff] %v1645_v20  ;;  %2336 = vtanh.f32 %v1468_v15  ;;  %v1402_v40 = vadd.f32 %v2898_v43, %v2815_v35 }
 0x3c1   : > { %v2317_v26 = vpop.eup %2316  ;;  %v1648_v31 = vmul.f32 0.5, %v1584_v21  ;;  %1710 = vst [vmem:[%s2848_s15 + $0xe0] sm:$0xff] %v1646_v27  ;;  %2338 = vtanh.f32 %v1467_v22  ;;  %v1470_v46 = vmul.f32 0.5, %v1289_v33  ;;  %v1291_v52 = vadd.f32 %v2901_v48, %v2817_v24 }
 0x3c2   : > { %v2319_v30 = vpop.eup %2318  ;;  %v1585_v32 = vadd.f32 1.0, %v2317_v26  ;;  %v1647_v38 = vmul.f32 0.5, %v1583_v28  ;;  %2340 = vtanh.f32 %v1469_v29  ;;  %v1472_v51 = vmul.f32 0.5, %v1402_v40 }
 0x3c3   : > { %v2321_v37 = vpop.eup %2320  ;;  %v1586_v39 = vadd.f32 1.0, %v2319_v30  ;;  %1712 = vst [vmem:[%s2848_s15 + $0xf0] sm:$0xff] %v1648_v31  ;;  %v2946_v53 = vpop.f32.mrb[52].mxu1  ;;  %2342 = vtanh.f32 %v1470_v46  ;;  %v1404_v57 = vadd.f32 %v2903_v49, %v2819_v36  ;;  %v1471_v62 = vmul.f32 0.5, %v1291_v52 }
 0x3c4   : > { %v2323_v41 = vpop.eup %2322  ;;  %v1649_v44 = vmul.f32 0.5, %v1585_v32  ;;  %v1588_v45 = vadd.f32 1.0, %v2321_v37  ;;  %1711 = vst [vmem:[%s2848_s15 + $0xe8] sm:$0xff] %v1647_v38  ;;  %v2948_v54 = vpop.f32.mrb[52].mxu0  ;;  %2344 = vtanh.f32 %v1472_v51  ;;  %v1295_v7 = vadd.f32 %v2916_v4, %v2813_v34 }
 0x3c5   : > { %v2325_v47 = vpop.eup %2324  ;;  %v1650_v50 = vmul.f32 0.5, %v1586_v39  ;;  %v1587_v42 = vadd.f32 1.0, %v2323_v41  ;;  %v2953_v58 = vpop.f32.mrb[53].mxu1  ;;  %v1473_v3 = vmul.f32 0.5, %v1404_v57  ;;  %2346 = vtanh.f32 %v1471_v62 }
 0x3c6   : > { %v2327_v43 = vpop.eup %2326  ;;  %1713 = vst [vmem:[%s2848_s15 + $0xf8] sm:$0xff] %v1649_v44  ;;  %v1652_v55 = vmul.f32 0.5, %v1588_v45  ;;  %v1589_v56 = vadd.f32 1.0, %v2325_v47  ;;  %v2955_v59 = vpop.f32.mrb[53].mxu0  ;;  %v1408_v13 = vadd.f32 %v2918_v6, %v2815_v35  ;;  %v1474_v16 = vmul.f32 0.5, %v1295_v7 }
 0x3c7   : > { %v2329_v60 = vpop.eup %2328  ;;  %1714 = vst [vmem:[%s2848_s15 + $0x100] sm:$0xff] %v1650_v50  ;;  %v1651_v48 = vmul.f32 0.5, %v1587_v42  ;;  %v1590_v61 = vadd.f32 1.0, %v2327_v43  ;;  %v2958_v63 = vpop.f32.mrb[54].mxu1  ;;  %2348 = vtanh.f32 %v1473_v3  ;;  %v1297_v4 = vadd.f32 %v2922_v10, %v2817_v24 }
 0x3c8   : > { %v2960_v0 = vpop.f32.mrb[54].mxu0  ;;  %v2331_v1 = vpop.eup %2330  ;;  %1716 = vst [vmem:[%s2848_s15 + $0x110] sm:$0xff] %v1652_v55  ;;  %v1653_v2 = vmul.f32 0.5, %v1589_v56  ;;  %v1592_v49 = vadd.f32 1.0, %v2329_v60  ;;  %v1476_v22 = vmul.f32 0.5, %v1408_v13  ;;  %v1410_v26 = vadd.f32 %v2924_v11, %v2819_v36 }
 0x3c9   : > { %v2965_v8 = vpop.f32.mrb[55].mxu1  ;;  %v2967_v9 = vpop.f32.mrb[55].mxu0  ;;  %1715 = vst [vmem:[%s2848_s15 + $0x108] sm:$0xff] %v1651_v48  ;;  %v1654_v5 = vmul.f32 0.5, %v1590_v61  ;;  %v1591_v12 = vadd.f32 1.0, %v2331_v1  ;;  %2350 = vtanh.f32 %v1474_v16  ;;  %v1475_v28 = vmul.f32 0.5, %v1297_v4 }
 0x3ca   : > { %v2333_v14 = vpop.eup %2332  ;;  %1717 = vst [vmem:[%s2848_s15 + $0x118] sm:$0xff] %v1653_v2  ;;  %v1656_v15 = vmul.f32 0.5, %v1592_v49  ;;  %v1299_v29 = vadd.f32 %v2928_v17, %v2813_v34  ;;  %2352 = vtanh.f32 %v1476_v22  ;;  %v1477_v32 = vmul.f32 0.5, %v1410_v26 }
 0x3cb   : > { %v2335_v19 = vpop.eup %2334  ;;  %1718 = vst [vmem:[%s2848_s15 + $0x120] sm:$0xff] %v1654_v5  ;;  %v1655_v20 = vmul.f32 0.5, %v1591_v12  ;;  %v1593_v21 = vadd.f32 1.0, %v2333_v14  ;;  %2354 = vtanh.f32 %v1475_v28  ;;  %v1412_v17 = vadd.f32 %v2930_v18, %v2815_v35 }
 0x3cc   : > { %v2337_v27 = vpop.eup %2336  ;;  %1720 = vst [vmem:[%s2848_s15 + $0x130] sm:$0xff] %v1656_v15  ;;  %v1594_v6 = vadd.f32 1.0, %v2335_v19  ;;  %v1478_v38 = vmul.f32 0.5, %v1299_v29  ;;  %2356 = vtanh.f32 %v1477_v32  ;;  %v1301_v45 = vadd.f32 %v2932_v23, %v2817_v24 }
 0x3cd   : > { %v2339_v30 = vpop.eup %2338  ;;  %1719 = vst [vmem:[%s2848_s15 + $0x128] sm:$0xff] %v1655_v20  ;;  %v1657_v10 = vmul.f32 0.5, %v1593_v21  ;;  %v1596_v31 = vadd.f32 1.0, %v2337_v27  ;;  %v1414_v46 = vadd.f32 %v2934_v25, %v2819_v36  ;;  %v1480_v51 = vmul.f32 0.5, %v1412_v17 }
 0x3ce   : > { %v2341_v33 = vpop.eup %2340  ;;  %v1658_v37 = vmul.f32 0.5, %v1594_v6  ;;  %v1595_v11 = vadd.f32 1.0, %v2339_v30  ;;  %2358 = vtanh.f32 %v1478_v38  ;;  %v1305_v52 = vadd.f32 %v2946_v53, %v2813_v34 }
 0x3cf   : > { %1721 = vst [vmem:[%s2848_s15 + $0x138] sm:$0xff] %v1657_v10  ;;  %v1660_v39 = vmul.f32 0.5, %v1596_v31  ;;  %v1597_v40 = vadd.f32 1.0, %v2341_v33  ;;  %v2343_v41 = vpop.eup %2342  ;;  %v1479_v43 = vmul.f32 0.5, %v1301_v45  ;;  %v1481_v55 = vmul.f32 0.5, %v1414_v46 }
 0x3d0   : > { %1722 = vst [vmem:[%s2848_s15 + $0x140] sm:$0xff] %v1658_v37  ;;  %v1659_v44 = vmul.f32 0.5, %v1595_v11  ;;  %v2345_v47 = vpop.eup %2344  ;;  %v1598_v42 = vadd.f32 1.0, %v2343_v41  ;;  %v1418_v56 = vadd.f32 %v2948_v54, %v2815_v35  ;;  %2360 = vtanh.f32 %v1480_v51 }
 0x3d1   : > { %1724 = vst [vmem:[%s2848_s15 + $0x150] sm:$0xff] %v1660_v39  ;;  %v1661_v50 = vmul.f32 0.5, %v1597_v40  ;;  %v1600_v18 = vadd.f32 1.0, %v2345_v47  ;;  %v2347_v23 = vpop.eup %2346  ;;  %v1482_v57 = vmul.f32 0.5, %v1305_v52  ;;  %v1307_v60 = vadd.f32 %v2953_v58, %v2817_v24 }
 0x3d2   : > { %1723 = vst [vmem:[%s2848_s15 + $0x148] sm:$0xff] %v1659_v44  ;;  %v1662_v25 = vmul.f32 0.5, %v1598_v42  ;;  %v2349_v48 = vpop.eup %2348  ;;  %v1599_v53 = vadd.f32 1.0, %v2347_v23  ;;  %2362 = vtanh.f32 %v1479_v43  ;;  %v1484_v62 = vmul.f32 0.5, %v1418_v56 }
 0x3d3   : > { %1725 = vst [vmem:[%s2848_s15 + $0x158] sm:$0xff] %v1661_v50  ;;  %v1664_v61 = vmul.f32 0.5, %v1600_v18  ;;  %v1601_v1 = vadd.f32 1.0, %v2349_v48  ;;  %2364 = vtanh.f32 %v1481_v55  ;;  %v1483_v2 = vmul.f32 0.5, %v1307_v60  ;;  %v2351_v49 = vpop.eup %2350 }
 0x3d4   : > { %1726 = vst [vmem:[%s2848_s15 + $0x160] sm:$0xff] %v1662_v25  ;;  %v1420_v54 = vadd.f32 %v2955_v59, %v2819_v36  ;;  %v1663_v3 = vmul.f32 0.5, %v1599_v53  ;;  %2366 = vtanh.f32 %v1482_v57  ;;  %v1309_v58 = vadd.f32 %v2958_v63, %v2813_v34  ;;  %v2353_v5 = vpop.eup %2352 }
 0x3d5   : > { %1728 = vst [vmem:[%s2848_s15 + $0x170] sm:$0xff] %v1664_v61  ;;  %v1422_v7 = vadd.f32 %v2960_v0, %v2815_v35  ;;  %v1665_v12 = vmul.f32 0.5, %v1601_v1  ;;  %v1602_v13 = vadd.f32 1.0, %v2351_v49  ;;  %2368 = vtanh.f32 %v1484_v62  ;;  %v2355_v15 = vpop.eup %2354 }
 0x3d6   : > { %v1485_v14 = vmul.f32 0.5, %v1420_v54  ;;  %1727 = vst [vmem:[%s2848_s15 + $0x168] sm:$0xff] %v1663_v3  ;;  %v1604_v59 = vadd.f32 1.0, %v2353_v5  ;;  %2370 = vtanh.f32 %v1483_v2  ;;  %v1486_v16 = vmul.f32 0.5, %v1309_v58  ;;  %v2357_v19 = vpop.eup %2356 }
 0x3d7   : > { %v1488_v4 = vmul.f32 0.5, %v1422_v7  ;;  %1729 = vst [vmem:[%s2848_s15 + $0x178] sm:$0xff] %v1665_v12  ;;  %v1666_v20 = vmul.f32 0.5, %v1602_v13  ;;  %v1603_v34 = vadd.f32 1.0, %v2355_v15  ;;  %v1311_v35 = vadd.f32 %v2965_v8, %v2817_v24 }
 0x3d8   : > { %2372 = vtanh.f32 %v1485_v14  ;;  %v2359_v63 = vpop.eup %2358  ;;  %v1668_v0 = vmul.f32 0.5, %v1604_v59  ;;  %v1605_v21 = vadd.f32 1.0, %v2357_v19  ;;  %v1424_v22 = vadd.f32 %v2967_v9, %v2819_v36 }
 0x3d9   : > { %2374 = vtanh.f32 %v1486_v16  ;;  %1730 = vst [vmem:[%s2848_s15 + $0x180] sm:$0xff] %v1666_v20  ;;  %v1667_v26 = vmul.f32 0.5, %v1603_v34  ;;  %v1606_v27 = vadd.f32 1.0, %v2359_v63  ;;  %v1487_v6 = vmul.f32 0.5, %v1311_v35 }
 0x3da   : > { %2376 = vtanh.f32 %v1488_v4  ;;  %1732 = vst [vmem:[%s2848_s15 + $0x190] sm:$0xff] %v1668_v0  ;;  %v1669_v28 = vmul.f32 0.5, %v1605_v21  ;;  %v1489_v29 = vmul.f32 0.5, %v1424_v22  ;;  %v2361_v30 = vpop.eup %2360 }
 0x3db   : > { %1731 = vst [vmem:[%s2848_s15 + $0x188] sm:$0xff] %v1667_v26  ;;  %v1670_v24 = vmul.f32 0.5, %v1606_v27  ;;  %2378 = vtanh.f32 %v1487_v6  ;;  %v1608_v10 = vadd.f32 1.0, %v2361_v30 }
 0x3dc   : > { %v2363_v8 = vpop.eup %2362  ;;  %1733 = vst [vmem:[%s2848_s15 + $0x198] sm:$0xff] %v1669_v28  ;;  %2380 = vtanh.f32 %v1489_v29 }
 0x3dd   : > { %v2365_v36 = vpop.eup %2364  ;;  %1734 = vst [vmem:[%s2848_s15 + $0x1a0] sm:$0xff] %v1670_v24  ;;  %v1607_v9 = vadd.f32 1.0, %v2363_v8  ;;  %v1672_v32 = vmul.f32 0.5, %v1608_v10 }
 0x3de   : > { %v2367_v31 = vpop.eup %2366  ;;  %v1609_v33 = vadd.f32 1.0, %v2365_v36 }
 0x3df   : > { %v2369_v37 = vpop.eup %2368  ;;  %v1671_v11 = vmul.f32 0.5, %v1607_v9  ;;  %v1610_v38 = vadd.f32 1.0, %v2367_v31  ;;  %1736 = vst [vmem:[%s2848_s15 + $0x1b0] sm:$0xff] %v1672_v32 }
 0x3e0   : > { %v2371_v39 = vpop.eup %2370  ;;  %v1673_v40 = vmul.f32 0.5, %v1609_v33  ;;  %v1612_v17 = vadd.f32 1.0, %v2369_v37 }
 0x3e1   : > { %1735 = vst [vmem:[%s2848_s15 + $0x1a8] sm:$0xff] %v1671_v11  ;;  %v1674_v44 = vmul.f32 0.5, %v1610_v38  ;;  %v1611_v45 = vadd.f32 1.0, %v2371_v39 }
 0x3e2   : > { %v2373_v41 = vpop.eup %2372  ;;  %1737 = vst [vmem:[%s2848_s15 + $0x1b8] sm:$0xff] %v1673_v40  ;;  %v1676_v47 = vmul.f32 0.5, %v1612_v17 }
 0x3e3   : > { %v2375_v46 = vpop.eup %2374  ;;  %v1613_v50 = vadd.f32 1.0, %v2373_v41  ;;  %1738 = vst [vmem:[%s2848_s15 + $0x1c0] sm:$0xff] %v1674_v44  ;;  %v1675_v51 = vmul.f32 0.5, %v1611_v45 }
 0x3e4   : > { %v2377_v42 = vpop.eup %2376  ;;  %v1614_v52 = vadd.f32 1.0, %v2375_v46  ;;  %1740 = vst [vmem:[%s2848_s15 + $0x1d0] sm:$0xff] %v1676_v47 }
 0x3e5   : > { %v1677_v18 = vmul.f32 0.5, %v1613_v50  ;;  %v1616_v43 = vadd.f32 1.0, %v2377_v42  ;;  %v2379_v55 = vpop.eup %2378  ;;  %1739 = vst [vmem:[%s2848_s15 + $0x1c8] sm:$0xff] %v1675_v51 }
 0x3e6   : > { %v1678_v56 = vmul.f32 0.5, %v1614_v52  ;;  %v2381_v23 = vpop.eup %2380  ;;  %v1615_v57 = vadd.f32 1.0, %v2379_v55 }
 0x3e7   : > { %1741 = vst [vmem:[%s2848_s15 + $0x1d8] sm:$0xff] %v1677_v18  ;;  %v1680_v25 = vmul.f32 0.5, %v1616_v43  ;;  %v1617_v60 = vadd.f32 1.0, %v2381_v23 }
 0x3e8   : > { %1742 = vst [vmem:[%s2848_s15 + $0x1e0] sm:$0xff] %v1678_v56  ;;  %v1679_v48 = vmul.f32 0.5, %v1615_v57 }
 0x3e9   : > { %1744 = vst [vmem:[%s2848_s15 + $0x1f0] sm:$0xff] %v1680_v25  ;;  %v1681_v61 = vmul.f32 0.5, %v1617_v60 }
 0x3ea   : > { %1743 = vst [vmem:[%s2848_s15 + $0x1e8] sm:$0xff] %v1679_v48 }
 0x3eb   : > { %1745 = vst [vmem:[%s2848_s15 + $0x1f8] sm:$0xff] %v1681_v61 }
 0x3ec   : > { %2395 = shalt.err (!%p2392_p5)
}
 0x3ed   : > { %s2396_s27 = scalar_lea.hbm %s3032_s23, 8192  ;;  %s2400_s18 = scalar_lea.hbm %s3095_s9, 16384 }
 0x3ee   : > { %p2397_p6 = scmp.ne.s32.totalorder %s3032_s23, %s2396_s27  ;;  %p2401_p10 = scmp.lt.u32.totalorder %s3032_s23, %s3095_s9 }
 0x3ef   : > { %p2402_p11 = scmp.lt.u32.totalorder %s2400_s18, %s2396_s27  ;;  %p2404_p13 = scmp.lt.u32.totalorder %s2396_s27, %s3032_s23 }
 0x3f0   : > { %p2398_p7 = pnand %p2397_p6, %p2556_p4 }
 0x3f1   : > { %p2403_p12 = por %p2402_p11, %p2401_p10 }
 0x3f2   : > { %p2399_p9 = pneg %p2398_p7 }
 0x3f3   : > { %p2405_p0 = por %p2404_p13, %p2403_p12 }
 0x3f5   : > { %p2406_p1 = pnand %p2405_p0, %p2399_p9 }
 0x3f7   : > { %2409 = shalt.err (!%p2406_p1)
}
 0x3f8   : > { %s2464_s24 = smov 512   ;;  %s2465_s26 = smov 32  }
 0x3f9   : > { %2184 = dma.vmem_to_hbm [thread:$0]  (%p2556_p4), %s3034_s16, 8192, %s3032_s23, %s3040_s12, %s2464_s24, %s2464_s24, %s2465_s26  }
 0x3fa PF: > { %p2190_p2 = scmp.ge.s32.totalorder %s2460_s14, 2  ;;  %s1778_s28 = sand.u32 1, %s2440_s30  }
 0x3fb   : > { %s1779_s27 = scalar_lea.sflag [#allocation4], %s1778_s28 }
 0x3fc   : > { %p2187_p3 = pnand %p2190_p2, %p2563_p8 }
 0x3fe   : > { %2435 = dma.done.wait (!%p2187_p3), %s1779_s27, 8192  }
 0x3ff   : > { %2437 = vsyncadd (!%p2187_p3), %s1779_s27, 4294959104  ;;  %s22_s14 = sadd.s32 1, %s2460_s14   ;;  %s3098_s30 = smov %s2444_s10 }
 0x400   : > { %p19_p5 = scmp.ge.s32.totalorder %s22_s14, 4   ;;  %s3099_s10 = smov %s2448_s11 }
 0x401   : > { %s3100_s11 = smov %s2569_s22  ;;  %s3101_s12 = smov %s2456_s13 }
 0x402   : > { %s3102_s13 = smov %s3104_s17  ;;  %21 = sbr.rel (!%p19_p5) target bundleno = 4 (0x4), region = 101 }
 0x409   :  { %1784 = vsyncpa [#allocation4], 1 }
 0x40a   :  { %1786 = vsyncpa [#allocation4 + $0x1], 1 }

</bundles_post_ra>
